<compile_context>
chip_gen: v6e
topology: v6e:2x2x1
jax: 0.10.0
libtpu: 0.0.40
codegen_flags: <defaults>
</compile_context>

<pallas_src>
import functools

import jax
import jax.numpy as jnp
import numpy as np
from jax.experimental import pallas as pl
from jax.experimental.pallas import tpu as pltpu


# ---------------------------------------------------------------------------
# Pallas kernel factory: 2-layer bidirectional LSTM + final Linear, one call.
# ---------------------------------------------------------------------------
def make_lstm_kernel(T, B, H):
    H2 = 2 * H  # packed (fwd||bwd) width

    def kernel(x_ref,                       # (T*B, D) time-major, flattened
               w0a_ref, w0b_ref, b0_ref,    # layer-0 hoisted input proj (D,8H)x2, (1,8H)
               whh0_ref,                    # layer-0 block-diag recurrent (2H,8H)
               w1s_ref, w1c_ref, b1_ref,    # layer-1 hoisted input proj (2H,8H)x2, (1,8H)
               whh1_ref,                    # layer-1 block-diag recurrent (2H,8H)
               fcw_ref, fcb_ref,            # fc: (2H,C), (1,C)
               out_ref):                    # (B, C)
        # ---- hoisted layer-0 input projections (one-time MXU work) ----------
        x = x_ref[...]                                              # (T*B, D)
        pre_a0 = (jnp.dot(x, w0a_ref[...], preferred_element_type=jnp.float32)
                  + b0_ref[...])                                    # fwd gate cols + bias
        pre_b0 = jnp.dot(x, w0b_ref[...],
                         preferred_element_type=jnp.float32)        # bwd gate cols

        whh0 = whh0_ref[...]
        whh1 = whh1_ref[...]

        def packed_cell(pre, h, c, whh):
            # packed gates, lane layout [i | f | g | o], each 2H = fwd || bwd
            g = pre + jnp.dot(h, whh, preferred_element_type=jnp.float32)
            i_g = jax.nn.sigmoid(g[:, 0 * H2:1 * H2])
            f_g = jax.nn.sigmoid(g[:, 1 * H2:2 * H2])
            g_g = jnp.tanh(g[:, 2 * H2:3 * H2])
            o_g = jax.nn.sigmoid(g[:, 3 * H2:4 * H2])
            c_new = f_g * c + i_g * g_g
            h_new = o_g * jnp.tanh(c_new)
            return h_new, c_new

        zero = jnp.zeros((B, H2), jnp.float32)

        # ---- layer 0: fused fwd+bwd, fully unrolled over T -----------------
        h, c = zero, zero
        outs0 = []
        for s in range(T):      # fwd reads time s, bwd reads time T-1-s
            pre = (pre_a0[s * B:(s + 1) * B, :]
                   + pre_b0[(T - 1 - s) * B:(T - s) * B, :])
            h, c = packed_cell(pre, h, c, whh0)
            outs0.append(h)     # row block s = [h0_fwd(t=s) | h0_bwd(t=T-1-s)]

        o_pack = jnp.concatenate(outs0, axis=0)                     # (T*B, 2H)

        # ---- hoisted layer-1 input projections (layer-1 concat folded in) --
        pre_s1 = (jnp.dot(o_pack, w1s_ref[...],
                          preferred_element_type=jnp.float32) + b1_ref[...])
        pre_c1 = jnp.dot(o_pack, w1c_ref[...],
                         preferred_element_type=jnp.float32)

        # ---- layer 1: fused fwd+bwd, fully unrolled over T -----------------
        h, c = zero, zero
        for s in range(T):
            pre = (pre_s1[s * B:(s + 1) * B, :]
                   + pre_c1[(T - 1 - s) * B:(T - s) * B, :])
            h, c = packed_cell(pre, h, c, whh1)

        # h == [h1_fwd_final | h1_bwd_final] == cat(out[:, -1, :H], out[:, 0, H:])
        logits = (jnp.dot(h, fcw_ref[...], preferred_element_type=jnp.float32)
                  + fcb_ref[...])
        out_ref[...] = logits.astype(out_ref.dtype)

    return kernel


# ---------------------------------------------------------------------------
# PyTorch-style raw parameters (deterministic uniform init, nn.LSTM layout)
# ---------------------------------------------------------------------------
def init_raw_params(key, input_dim, hidden_dim, num_classes):
    H = hidden_dim
    k_lstm = 1.0 / np.sqrt(H)
    k_fc = 1.0 / np.sqrt(2 * H)

    def uni(k, shape, bound):
        return jax.random.uniform(k, shape, jnp.float32, minval=-bound, maxval=bound)

    keys = jax.random.split(key, 18)
    ki = iter(range(18))
    raw = {}
    for name, in_dim in (("l0f", input_dim), ("l0b", input_dim),
                         ("l1f", 2 * H), ("l1b", 2 * H)):
        raw[name] = {
            "w_ih": uni(keys[next(ki)], (4 * H, in_dim), k_lstm),  # (4H, in)
            "w_hh": uni(keys[next(ki)], (4 * H, H), k_lstm),       # (4H, H)
            "b_ih": uni(keys[next(ki)], (4 * H,), k_lstm),
            "b_hh": uni(keys[next(ki)], (4 * H,), k_lstm),
        }
    raw["fc"] = {"w": uni(keys[next(ki)], (num_classes, 2 * H), k_fc),
                 "b": uni(keys[next(ki)], (num_classes,), k_fc)}
    return raw


# ---------------------------------------------------------------------------
# Pack raw params into the kernel's interleaved-gate / block-diagonal layout.
# Gate lane layout: [i | f | g | o], each 2H wide = [fwd H | bwd H].
# ---------------------------------------------------------------------------
def pack_params(raw, hidden_dim, input_dim, num_classes):
    H = hidden_dim
    H2, G8 = 2 * H, 8 * H

    def npf(a):
        return np.asarray(a, np.float32)

    l0f, l0b = raw["l0f"], raw["l0b"]
    l1f, l1b = raw["l1f"], raw["l1b"]

    w0a = np.zeros((input_dim, G8), np.float32)   # fwd cols only
    w0b = np.zeros((input_dim, G8), np.float32)   # bwd cols only
    b0 = np.zeros((1, G8), np.float32)
    whh0 = np.zeros((H2, G8), np.float32)
    w1s = np.zeros((H2, G8), np.float32)          # "same-index" contributions
    w1c = np.zeros((H2, G8), np.float32)          # "cross-index" contributions
    b1 = np.zeros((1, G8), np.float32)
    whh1 = np.zeros((H2, G8), np.float32)

    for q in range(4):                            # gate q in PyTorch order i,f,g,o
        gr = slice(q * H, (q + 1) * H)            # gate rows in (4H, ...) weights
        fcol = slice(q * H2, q * H2 + H)          # fwd lanes of packed gate q
        bcol = slice(q * H2 + H, (q + 1) * H2)    # bwd lanes of packed gate q

        # ---- layer 0 hoisted input projection ----
        w0a[:, fcol] = npf(l0f["w_ih"])[gr, :].T
        w0b[:, bcol] = npf(l0b["w_ih"])[gr, :].T
        b0[0, fcol] = npf(l0f["b_ih"])[gr] + npf(l0f["b_hh"])[gr]
        b0[0, bcol] = npf(l0b["b_ih"])[gr] + npf(l0b["b_hh"])[gr]

        # ---- layer 0 block-diagonal recurrent weight ----
        whh0[0:H, fcol] = npf(l0f["w_hh"])[gr, :].T
        whh0[H:H2, bcol] = npf(l0b["w_hh"])[gr, :].T

        # ---- layer 1 hoisted input projection (concat folded into weights) ----
        # o_pack row block s = [h0_fwd(s) | h0_bwd(T-1-s)]
        # pre1[s] = o_pack[s] @ w1s + o_pack[T-1-s] @ w1c + b1
        w1s[0:H, fcol] = npf(l1f["w_ih"])[gr, 0:H].T     # h0_fwd(s) -> fwd gates(s)
        w1s[H:H2, bcol] = npf(l1b["w_ih"])[gr, H:H2].T   # h0_bwd(T-1-s) -> bwd gates(s)
        w1c[H:H2, fcol] = npf(l1f["w_ih"])[gr, H:H2].T   # h0_bwd(s) -> fwd gates(s)
        w1c[0:H, bcol] = npf(l1b["w_ih"])[gr, 0:H].T     # h0_fwd(T-1-s) -> bwd gates(s)
        b1[0, fcol] = npf(l1f["b_ih"])[gr] + npf(l1f["b_hh"])[gr]
        b1[0, bcol] = npf(l1b["b_ih"])[gr] + npf(l1b["b_hh"])[gr]

        # ---- layer 1 block-diagonal recurrent weight ----
        whh1[0:H, fcol] = npf(l1f["w_hh"])[gr, :].T
        whh1[H:H2, bcol] = npf(l1b["w_hh"])[gr, :].T

    fcw = npf(raw["fc"]["w"]).T                          # (2H, C)
    fcb = npf(raw["fc"]["b"]).reshape(1, num_classes)    # (1, C)

    return [jnp.asarray(a) for a in
            (w0a, w0b, b0, whh0, w1s, w1c, b1, whh1, fcw, fcb)]


# ---------------------------------------------------------------------------
# Wrapper
# ---------------------------------------------------------------------------
@functools.partial(jax.jit, static_argnames=("hidden_dim", "num_classes"))
def main_model_forward(x_btd, packed, *, hidden_dim, num_classes):
    """x_btd: (B, T, 128) feature sequence (batch_first, like PyTorch)."""
    B, T, D = x_btd.shape
    H = hidden_dim
    # time-major, flattened: row block t = features at time t for all batches
    x_tm = jnp.transpose(x_btd, (1, 0, 2)).reshape(T * B, D).astype(jnp.float32)

    kernel = make_lstm_kernel(T=T, B=B, H=H)
    vmem = pl.BlockSpec(memory_space=pltpu.MemorySpace.VMEM)
    return pl.pallas_call(
        kernel,
        out_shape=jax.ShapeDtypeStruct((B, num_classes), jnp.float32),
        in_specs=[vmem] * (1 + len(packed)),
        out_specs=vmem,
    )(x_tm, *packed)


# ---------------------------------------------------------------------------
# Pure-JAX reference (straightforward bidirectional 2-layer LSTM + fc)
# ---------------------------------------------------------------------------
def reference_forward(x_btd, raw, hidden_dim):
    H = hidden_dim
    B, T, _ = x_btd.shape
    x = x_btd.astype(jnp.float32)

    def cell(x_t, h, c, p):
        g = x_t @ p["w_ih"].T + h @ p["w_hh"].T + p["b_ih"] + p["b_hh"]
        i = jax.nn.sigmoid(g[:, 0 * H:1 * H])
        f = jax.nn.sigmoid(g[:, 1 * H:2 * H])
        gg = jnp.tanh(g[:, 2 * H:3 * H])
        o = jax.nn.sigmoid(g[:, 3 * H:4 * H])
        c = f * c + i * gg
        return o * jnp.tanh(c), c

    def run(xs, p, reverse):
        h = jnp.zeros((B, H), jnp.float32)
        c = jnp.zeros((B, H), jnp.float32)
        buf = [None] * T
        order = range(T - 1, -1, -1) if reverse else range(T)
        for t in order:
            h, c = cell(xs[:, t], h, c, p)
            buf[t] = h
        return jnp.stack(buf, axis=1)            # (B, T, H)

    o0f = run(x, raw["l0f"], False)
    o0b = run(x, raw["l0b"], True)
    x1 = jnp.concatenate([o0f, o0b], axis=-1)
    o1f = run(x1, raw["l1f"], False)
    o1b = run(x1, raw["l1b"], True)
    out_f = o1f[:, -1, :]                         # out[:, -1, :H]
    out_b = o1b[:, 0, :]                          # out[:, 0, H:]
    feats = jnp.concatenate([out_f, out_b], axis=-1)
    return feats @ raw["fc"]["w"].T + raw["fc"]["b"]


if __name__ == "__main__":
    config = {"bidirectional": True, "hidden_dim": 32, "num_classes": 8}
    B, T, D = 2, 8, 128   # D = 128 is hard-coded in PlainLSTM (input_dim)

    x = jax.random.normal(jax.random.PRNGKey(0), (B, T, D), jnp.float32)
    raw = init_raw_params(jax.random.PRNGKey(42), D,
                          config["hidden_dim"], config["num_classes"])
    packed = pack_params(raw, config["hidden_dim"], D, config["num_classes"])

    out = main_model_forward(
        x, packed,
        hidden_dim=config["hidden_dim"], num_classes=config["num_classes"])
    out = jax.block_until_ready(out)

    ref = reference_forward(x, raw, config["hidden_dim"])
    assert out.shape == (B, config["num_classes"])
    err = np.max(np.abs(np.asarray(out) - np.asarray(ref)))
    assert np.allclose(np.asarray(out), np.asarray(ref), rtol=2e-3, atol=2e-3), err
    print("KERNEL_OK")
</pallas_src>

<mosaic_0001>
module attributes {stable_mosaic.version = 11 : i64} {
  func.func @kernel(%arg0: memref<16x128xf32, #tpu.memory_space<vmem>>, %arg1: memref<128x256xf32, #tpu.memory_space<vmem>>, %arg2: memref<128x256xf32, #tpu.memory_space<vmem>>, %arg3: memref<1x256xf32, #tpu.memory_space<vmem>>, %arg4: memref<64x256xf32, #tpu.memory_space<vmem>>, %arg5: memref<64x256xf32, #tpu.memory_space<vmem>>, %arg6: memref<64x256xf32, #tpu.memory_space<vmem>>, %arg7: memref<1x256xf32, #tpu.memory_space<vmem>>, %arg8: memref<64x256xf32, #tpu.memory_space<vmem>>, %arg9: memref<64x8xf32, #tpu.memory_space<vmem>>, %arg10: memref<1x8xf32, #tpu.memory_space<vmem>>, %arg11: memref<2x8xf32, #tpu.memory_space<vmem>>) attributes {dimension_semantics = [], scalar_prefetch = 0 : i64, scratch_operands = 0 : i64, tpu.core_type = #tpu.core_type<tc>} {
    %c0 = arith.constant 0 : index
    %c0_0 = arith.constant 0 : index
    %0 = vector.load %arg0[%c0, %c0_0] : memref<16x128xf32, #tpu.memory_space<vmem>>, vector<16x128xf32>
    %c0_1 = arith.constant 0 : index
    %c0_2 = arith.constant 0 : index
    %1 = vector.load %arg1[%c0_1, %c0_2] : memref<128x256xf32, #tpu.memory_space<vmem>>, vector<128x256xf32>
    %cst = arith.constant dense<0.000000e+00> : vector<16x256xf32>
    %2 = tpu.matmul %0, %1, %cst {dimension_numbers = #tpu.dot_dimension_numbers<[1], [0], [0], [1], [0, 0, 1, 1], [], []>} : vector<16x128xf32>, vector<128x256xf32>, vector<16x256xf32> -> vector<16x256xf32>
    %c0_3 = arith.constant 0 : index
    %c0_4 = arith.constant 0 : index
    %3 = vector.load %arg3[%c0_3, %c0_4] : memref<1x256xf32, #tpu.memory_space<vmem>>, vector<1x256xf32>
    %4 = vector.broadcast %3 : vector<1x256xf32> to vector<16x256xf32>
    %5 = arith.addf %2, %4 : vector<16x256xf32>
    %c0_5 = arith.constant 0 : index
    %c0_6 = arith.constant 0 : index
    %6 = vector.load %arg2[%c0_5, %c0_6] : memref<128x256xf32, #tpu.memory_space<vmem>>, vector<128x256xf32>
    %cst_7 = arith.constant dense<0.000000e+00> : vector<16x256xf32>
    %7 = tpu.matmul %0, %6, %cst_7 {dimension_numbers = #tpu.dot_dimension_numbers<[1], [0], [0], [1], [0, 0, 1, 1], [], []>} : vector<16x128xf32>, vector<128x256xf32>, vector<16x256xf32> -> vector<16x256xf32>
    %c0_8 = arith.constant 0 : index
    %c0_9 = arith.constant 0 : index
    %8 = vector.load %arg4[%c0_8, %c0_9] : memref<64x256xf32, #tpu.memory_space<vmem>>, vector<64x256xf32>
    %c0_10 = arith.constant 0 : index
    %c0_11 = arith.constant 0 : index
    %9 = vector.load %arg8[%c0_10, %c0_11] : memref<64x256xf32, #tpu.memory_space<vmem>>, vector<64x256xf32>
    %cst_12 = arith.constant 0.000000e+00 : f32
    %10 = vector.broadcast %cst_12 : f32 to vector<2x64xf32>
    %11 = vector.extract_strided_slice %5 {offsets = [0, 0], sizes = [2, 256], strides = [1, 1]} : vector<16x256xf32> to vector<2x256xf32>
    %12 = vector.extract_strided_slice %7 {offsets = [14, 0], sizes = [2, 256], strides = [1, 1]} : vector<16x256xf32> to vector<2x256xf32>
    %13 = arith.addf %11, %12 : vector<2x256xf32>
    %cst_13 = arith.constant dense<0.000000e+00> : vector<2x256xf32>
    %14 = tpu.matmul %10, %8, %cst_13 {dimension_numbers = #tpu.dot_dimension_numbers<[1], [0], [0], [1], [0, 0, 1, 1], [], []>} : vector<2x64xf32>, vector<64x256xf32>, vector<2x256xf32> -> vector<2x256xf32>
    %15 = arith.addf %13, %14 : vector<2x256xf32>
    %16 = vector.extract_strided_slice %15 {offsets = [0, 0], sizes = [2, 64], strides = [1, 1]} : vector<2x256xf32> to vector<2x64xf32>
    %17 = arith.negf %16 : vector<2x64xf32>
    %18 = math.exp %17 : vector<2x64xf32>
    %cst_14 = arith.constant 1.000000e+00 : f32
    %19 = vector.broadcast %cst_14 : f32 to vector<2x64xf32>
    %20 = arith.addf %19, %18 : vector<2x64xf32>
    %21 = arith.divf %19, %20 : vector<2x64xf32>
    %22 = vector.extract_strided_slice %15 {offsets = [0, 64], sizes = [2, 64], strides = [1, 1]} : vector<2x256xf32> to vector<2x64xf32>
    %23 = arith.negf %22 : vector<2x64xf32>
    %24 = math.exp %23 : vector<2x64xf32>
    %cst_15 = arith.constant 1.000000e+00 : f32
    %25 = vector.broadcast %cst_15 : f32 to vector<2x64xf32>
    %26 = arith.addf %25, %24 : vector<2x64xf32>
    %27 = arith.divf %25, %26 : vector<2x64xf32>
    %28 = vector.extract_strided_slice %15 {offsets = [0, 128], sizes = [2, 64], strides = [1, 1]} : vector<2x256xf32> to vector<2x64xf32>
    %29 = math.tanh %28 : vector<2x64xf32>
    %30 = vector.extract_strided_slice %15 {offsets = [0, 192], sizes = [2, 64], strides = [1, 1]} : vector<2x256xf32> to vector<2x64xf32>
    %31 = arith.negf %30 : vector<2x64xf32>
    %32 = math.exp %31 : vector<2x64xf32>
    %cst_16 = arith.constant 1.000000e+00 : f32
    %33 = vector.broadcast %cst_16 : f32 to vector<2x64xf32>
    %34 = arith.addf %33, %32 : vector<2x64xf32>
    %35 = arith.divf %33, %34 : vector<2x64xf32>
    %36 = arith.mulf %27, %10 : vector<2x64xf32>
    %37 = arith.mulf %21, %29 : vector<2x64xf32>
    %38 = arith.addf %36, %37 : vector<2x64xf32>
    %39 = math.tanh %38 : vector<2x64xf32>
    %40 = arith.mulf %35, %39 : vector<2x64xf32>
    %41 = vector.extract_strided_slice %5 {offsets = [2, 0], sizes = [2, 256], strides = [1, 1]} : vector<16x256xf32> to vector<2x256xf32>
    %42 = vector.extract_strided_slice %7 {offsets = [12, 0], sizes = [2, 256], strides = [1, 1]} : vector<16x256xf32> to vector<2x256xf32>
    %43 = arith.addf %41, %42 : vector<2x256xf32>
    %cst_17 = arith.constant dense<0.000000e+00> : vector<2x256xf32>
    %44 = tpu.matmul %40, %8, %cst_17 {dimension_numbers = #tpu.dot_dimension_numbers<[1], [0], [0], [1], [0, 0, 1, 1], [], []>} : vector<2x64xf32>, vector<64x256xf32>, vector<2x256xf32> -> vector<2x256xf32>
    %45 = arith.addf %43, %44 : vector<2x256xf32>
    %46 = vector.extract_strided_slice %45 {offsets = [0, 0], sizes = [2, 64], strides = [1, 1]} : vector<2x256xf32> to vector<2x64xf32>
    %47 = arith.negf %46 : vector<2x64xf32>
    %48 = math.exp %47 : vector<2x64xf32>
    %cst_18 = arith.constant 1.000000e+00 : f32
    %49 = vector.broadcast %cst_18 : f32 to vector<2x64xf32>
    %50 = arith.addf %49, %48 : vector<2x64xf32>
    %51 = arith.divf %49, %50 : vector<2x64xf32>
    %52 = vector.extract_strided_slice %45 {offsets = [0, 64], sizes = [2, 64], strides = [1, 1]} : vector<2x256xf32> to vector<2x64xf32>
    %53 = arith.negf %52 : vector<2x64xf32>
    %54 = math.exp %53 : vector<2x64xf32>
    %cst_19 = arith.constant 1.000000e+00 : f32
    %55 = vector.broadcast %cst_19 : f32 to vector<2x64xf32>
    %56 = arith.addf %55, %54 : vector<2x64xf32>
    %57 = arith.divf %55, %56 : vector<2x64xf32>
    %58 = vector.extract_strided_slice %45 {offsets = [0, 128], sizes = [2, 64], strides = [1, 1]} : vector<2x256xf32> to vector<2x64xf32>
    %59 = math.tanh %58 : vector<2x64xf32>
    %60 = vector.extract_strided_slice %45 {offsets = [0, 192], sizes = [2, 64], strides = [1, 1]} : vector<2x256xf32> to vector<2x64xf32>
    %61 = arith.negf %60 : vector<2x64xf32>
    %62 = math.exp %61 : vector<2x64xf32>
    %cst_20 = arith.constant 1.000000e+00 : f32
    %63 = vector.broadcast %cst_20 : f32 to vector<2x64xf32>
    %64 = arith.addf %63, %62 : vector<2x64xf32>
    %65 = arith.divf %63, %64 : vector<2x64xf32>
    %66 = arith.mulf %57, %38 : vector<2x64xf32>
    %67 = arith.mulf %51, %59 : vector<2x64xf32>
    %68 = arith.addf %66, %67 : vector<2x64xf32>
    %69 = math.tanh %68 : vector<2x64xf32>
    %70 = arith.mulf %65, %69 : vector<2x64xf32>
    %71 = vector.extract_strided_slice %5 {offsets = [4, 0], sizes = [2, 256], strides = [1, 1]} : vector<16x256xf32> to vector<2x256xf32>
    %72 = vector.extract_strided_slice %7 {offsets = [10, 0], sizes = [2, 256], strides = [1, 1]} : vector<16x256xf32> to vector<2x256xf32>
    %73 = arith.addf %71, %72 : vector<2x256xf32>
    %cst_21 = arith.constant dense<0.000000e+00> : vector<2x256xf32>
    %74 = tpu.matmul %70, %8, %cst_21 {dimension_numbers = #tpu.dot_dimension_numbers<[1], [0], [0], [1], [0, 0, 1, 1], [], []>} : vector<2x64xf32>, vector<64x256xf32>, vector<2x256xf32> -> vector<2x256xf32>
    %75 = arith.addf %73, %74 : vector<2x256xf32>
    %76 = vector.extract_strided_slice %75 {offsets = [0, 0], sizes = [2, 64], strides = [1, 1]} : vector<2x256xf32> to vector<2x64xf32>
    %77 = arith.negf %76 : vector<2x64xf32>
    %78 = math.exp %77 : vector<2x64xf32>
    %cst_22 = arith.constant 1.000000e+00 : f32
    %79 = vector.broadcast %cst_22 : f32 to vector<2x64xf32>
    %80 = arith.addf %79, %78 : vector<2x64xf32>
    %81 = arith.divf %79, %80 : vector<2x64xf32>
    %82 = vector.extract_strided_slice %75 {offsets = [0, 64], sizes = [2, 64], strides = [1, 1]} : vector<2x256xf32> to vector<2x64xf32>
    %83 = arith.negf %82 : vector<2x64xf32>
    %84 = math.exp %83 : vector<2x64xf32>
    %cst_23 = arith.constant 1.000000e+00 : f32
    %85 = vector.broadcast %cst_23 : f32 to vector<2x64xf32>
    %86 = arith.addf %85, %84 : vector<2x64xf32>
    %87 = arith.divf %85, %86 : vector<2x64xf32>
    %88 = vector.extract_strided_slice %75 {offsets = [0, 128], sizes = [2, 64], strides = [1, 1]} : vector<2x256xf32> to vector<2x64xf32>
    %89 = math.tanh %88 : vector<2x64xf32>
    %90 = vector.extract_strided_slice %75 {offsets = [0, 192], sizes = [2, 64], strides = [1, 1]} : vector<2x256xf32> to vector<2x64xf32>
    %91 = arith.negf %90 : vector<2x64xf32>
    %92 = math.exp %91 : vector<2x64xf32>
    %cst_24 = arith.constant 1.000000e+00 : f32
    %93 = vector.broadcast %cst_24 : f32 to vector<2x64xf32>
    %94 = arith.addf %93, %92 : vector<2x64xf32>
    %95 = arith.divf %93, %94 : vector<2x64xf32>
    %96 = arith.mulf %87, %68 : vector<2x64xf32>
    %97 = arith.mulf %81, %89 : vector<2x64xf32>
    %98 = arith.addf %96, %97 : vector<2x64xf32>
    %99 = math.tanh %98 : vector<2x64xf32>
    %100 = arith.mulf %95, %99 : vector<2x64xf32>
    %101 = vector.extract_strided_slice %5 {offsets = [6, 0], sizes = [2, 256], strides = [1, 1]} : vector<16x256xf32> to vector<2x256xf32>
    %102 = vector.extract_strided_slice %7 {offsets = [8, 0], sizes = [2, 256], strides = [1, 1]} : vector<16x256xf32> to vector<2x256xf32>
    %103 = arith.addf %101, %102 : vector<2x256xf32>
    %cst_25 = arith.constant dense<0.000000e+00> : vector<2x256xf32>
    %104 = tpu.matmul %100, %8, %cst_25 {dimension_numbers = #tpu.dot_dimension_numbers<[1], [0], [0], [1], [0, 0, 1, 1], [], []>} : vector<2x64xf32>, vector<64x256xf32>, vector<2x256xf32> -> vector<2x256xf32>
    %105 = arith.addf %103, %104 : vector<2x256xf32>
    %106 = vector.extract_strided_slice %105 {offsets = [0, 0], sizes = [2, 64], strides = [1, 1]} : vector<2x256xf32> to vector<2x64xf32>
    %107 = arith.negf %106 : vector<2x64xf32>
    %108 = math.exp %107 : vector<2x64xf32>
    %cst_26 = arith.constant 1.000000e+00 : f32
    %109 = vector.broadcast %cst_26 : f32 to vector<2x64xf32>
    %110 = arith.addf %109, %108 : vector<2x64xf32>
    %111 = arith.divf %109, %110 : vector<2x64xf32>
    %112 = vector.extract_strided_slice %105 {offsets = [0, 64], sizes = [2, 64], strides = [1, 1]} : vector<2x256xf32> to vector<2x64xf32>
    %113 = arith.negf %112 : vector<2x64xf32>
    %114 = math.exp %113 : vector<2x64xf32>
    %cst_27 = arith.constant 1.000000e+00 : f32
    %115 = vector.broadcast %cst_27 : f32 to vector<2x64xf32>
    %116 = arith.addf %115, %114 : vector<2x64xf32>
    %117 = arith.divf %115, %116 : vector<2x64xf32>
    %118 = vector.extract_strided_slice %105 {offsets = [0, 128], sizes = [2, 64], strides = [1, 1]} : vector<2x256xf32> to vector<2x64xf32>
    %119 = math.tanh %118 : vector<2x64xf32>
    %120 = vector.extract_strided_slice %105 {offsets = [0, 192], sizes = [2, 64], strides = [1, 1]} : vector<2x256xf32> to vector<2x64xf32>
    %121 = arith.negf %120 : vector<2x64xf32>
    %122 = math.exp %121 : vector<2x64xf32>
    %cst_28 = arith.constant 1.000000e+00 : f32
    %123 = vector.broadcast %cst_28 : f32 to vector<2x64xf32>
    %124 = arith.addf %123, %122 : vector<2x64xf32>
    %125 = arith.divf %123, %124 : vector<2x64xf32>
    %126 = arith.mulf %117, %98 : vector<2x64xf32>
    %127 = arith.mulf %111, %119 : vector<2x64xf32>
    %128 = arith.addf %126, %127 : vector<2x64xf32>
    %129 = math.tanh %128 : vector<2x64xf32>
    %130 = arith.mulf %125, %129 : vector<2x64xf32>
    %131 = vector.extract_strided_slice %5 {offsets = [8, 0], sizes = [2, 256], strides = [1, 1]} : vector<16x256xf32> to vector<2x256xf32>
    %132 = vector.extract_strided_slice %7 {offsets = [6, 0], sizes = [2, 256], strides = [1, 1]} : vector<16x256xf32> to vector<2x256xf32>
    %133 = arith.addf %131, %132 : vector<2x256xf32>
    %cst_29 = arith.constant dense<0.000000e+00> : vector<2x256xf32>
    %134 = tpu.matmul %130, %8, %cst_29 {dimension_numbers = #tpu.dot_dimension_numbers<[1], [0], [0], [1], [0, 0, 1, 1], [], []>} : vector<2x64xf32>, vector<64x256xf32>, vector<2x256xf32> -> vector<2x256xf32>
    %135 = arith.addf %133, %134 : vector<2x256xf32>
    %136 = vector.extract_strided_slice %135 {offsets = [0, 0], sizes = [2, 64], strides = [1, 1]} : vector<2x256xf32> to vector<2x64xf32>
    %137 = arith.negf %136 : vector<2x64xf32>
    %138 = math.exp %137 : vector<2x64xf32>
    %cst_30 = arith.constant 1.000000e+00 : f32
    %139 = vector.broadcast %cst_30 : f32 to vector<2x64xf32>
    %140 = arith.addf %139, %138 : vector<2x64xf32>
    %141 = arith.divf %139, %140 : vector<2x64xf32>
    %142 = vector.extract_strided_slice %135 {offsets = [0, 64], sizes = [2, 64], strides = [1, 1]} : vector<2x256xf32> to vector<2x64xf32>
    %143 = arith.negf %142 : vector<2x64xf32>
    %144 = math.exp %143 : vector<2x64xf32>
    %cst_31 = arith.constant 1.000000e+00 : f32
    %145 = vector.broadcast %cst_31 : f32 to vector<2x64xf32>
    %146 = arith.addf %145, %144 : vector<2x64xf32>
    %147 = arith.divf %145, %146 : vector<2x64xf32>
    %148 = vector.extract_strided_slice %135 {offsets = [0, 128], sizes = [2, 64], strides = [1, 1]} : vector<2x256xf32> to vector<2x64xf32>
    %149 = math.tanh %148 : vector<2x64xf32>
    %150 = vector.extract_strided_slice %135 {offsets = [0, 192], sizes = [2, 64], strides = [1, 1]} : vector<2x256xf32> to vector<2x64xf32>
    %151 = arith.negf %150 : vector<2x64xf32>
    %152 = math.exp %151 : vector<2x64xf32>
    %cst_32 = arith.constant 1.000000e+00 : f32
    %153 = vector.broadcast %cst_32 : f32 to vector<2x64xf32>
    %154 = arith.addf %153, %152 : vector<2x64xf32>
    %155 = arith.divf %153, %154 : vector<2x64xf32>
    %156 = arith.mulf %147, %128 : vector<2x64xf32>
    %157 = arith.mulf %141, %149 : vector<2x64xf32>
    %158 = arith.addf %156, %157 : vector<2x64xf32>
    %159 = math.tanh %158 : vector<2x64xf32>
    %160 = arith.mulf %155, %159 : vector<2x64xf32>
    %161 = vector.extract_strided_slice %5 {offsets = [10, 0], sizes = [2, 256], strides = [1, 1]} : vector<16x256xf32> to vector<2x256xf32>
    %162 = vector.extract_strided_slice %7 {offsets = [4, 0], sizes = [2, 256], strides = [1, 1]} : vector<16x256xf32> to vector<2x256xf32>
    %163 = arith.addf %161, %162 : vector<2x256xf32>
    %cst_33 = arith.constant dense<0.000000e+00> : vector<2x256xf32>
    %164 = tpu.matmul %160, %8, %cst_33 {dimension_numbers = #tpu.dot_dimension_numbers<[1], [0], [0], [1], [0, 0, 1, 1], [], []>} : vector<2x64xf32>, vector<64x256xf32>, vector<2x256xf32> -> vector<2x256xf32>
    %165 = arith.addf %163, %164 : vector<2x256xf32>
    %166 = vector.extract_strided_slice %165 {offsets = [0, 0], sizes = [2, 64], strides = [1, 1]} : vector<2x256xf32> to vector<2x64xf32>
    %167 = arith.negf %166 : vector<2x64xf32>
    %168 = math.exp %167 : vector<2x64xf32>
    %cst_34 = arith.constant 1.000000e+00 : f32
    %169 = vector.broadcast %cst_34 : f32 to vector<2x64xf32>
    %170 = arith.addf %169, %168 : vector<2x64xf32>
    %171 = arith.divf %169, %170 : vector<2x64xf32>
    %172 = vector.extract_strided_slice %165 {offsets = [0, 64], sizes = [2, 64], strides = [1, 1]} : vector<2x256xf32> to vector<2x64xf32>
    %173 = arith.negf %172 : vector<2x64xf32>
    %174 = math.exp %173 : vector<2x64xf32>
    %cst_35 = arith.constant 1.000000e+00 : f32
    %175 = vector.broadcast %cst_35 : f32 to vector<2x64xf32>
    %176 = arith.addf %175, %174 : vector<2x64xf32>
    %177 = arith.divf %175, %176 : vector<2x64xf32>
    %178 = vector.extract_strided_slice %165 {offsets = [0, 128], sizes = [2, 64], strides = [1, 1]} : vector<2x256xf32> to vector<2x64xf32>
    %179 = math.tanh %178 : vector<2x64xf32>
    %180 = vector.extract_strided_slice %165 {offsets = [0, 192], sizes = [2, 64], strides = [1, 1]} : vector<2x256xf32> to vector<2x64xf32>
    %181 = arith.negf %180 : vector<2x64xf32>
    %182 = math.exp %181 : vector<2x64xf32>
    %cst_36 = arith.constant 1.000000e+00 : f32
    %183 = vector.broadcast %cst_36 : f32 to vector<2x64xf32>
    %184 = arith.addf %183, %182 : vector<2x64xf32>
    %185 = arith.divf %183, %184 : vector<2x64xf32>
    %186 = arith.mulf %177, %158 : vector<2x64xf32>
    %187 = arith.mulf %171, %179 : vector<2x64xf32>
    %188 = arith.addf %186, %187 : vector<2x64xf32>
    %189 = math.tanh %188 : vector<2x64xf32>
    %190 = arith.mulf %185, %189 : vector<2x64xf32>
    %191 = vector.extract_strided_slice %5 {offsets = [12, 0], sizes = [2, 256], strides = [1, 1]} : vector<16x256xf32> to vector<2x256xf32>
    %192 = vector.extract_strided_slice %7 {offsets = [2, 0], sizes = [2, 256], strides = [1, 1]} : vector<16x256xf32> to vector<2x256xf32>
    %193 = arith.addf %191, %192 : vector<2x256xf32>
    %cst_37 = arith.constant dense<0.000000e+00> : vector<2x256xf32>
    %194 = tpu.matmul %190, %8, %cst_37 {dimension_numbers = #tpu.dot_dimension_numbers<[1], [0], [0], [1], [0, 0, 1, 1], [], []>} : vector<2x64xf32>, vector<64x256xf32>, vector<2x256xf32> -> vector<2x256xf32>
    %195 = arith.addf %193, %194 : vector<2x256xf32>
    %196 = vector.extract_strided_slice %195 {offsets = [0, 0], sizes = [2, 64], strides = [1, 1]} : vector<2x256xf32> to vector<2x64xf32>
    %197 = arith.negf %196 : vector<2x64xf32>
    %198 = math.exp %197 : vector<2x64xf32>
    %cst_38 = arith.constant 1.000000e+00 : f32
    %199 = vector.broadcast %cst_38 : f32 to vector<2x64xf32>
    %200 = arith.addf %199, %198 : vector<2x64xf32>
    %201 = arith.divf %199, %200 : vector<2x64xf32>
    %202 = vector.extract_strided_slice %195 {offsets = [0, 64], sizes = [2, 64], strides = [1, 1]} : vector<2x256xf32> to vector<2x64xf32>
    %203 = arith.negf %202 : vector<2x64xf32>
    %204 = math.exp %203 : vector<2x64xf32>
    %cst_39 = arith.constant 1.000000e+00 : f32
    %205 = vector.broadcast %cst_39 : f32 to vector<2x64xf32>
    %206 = arith.addf %205, %204 : vector<2x64xf32>
    %207 = arith.divf %205, %206 : vector<2x64xf32>
    %208 = vector.extract_strided_slice %195 {offsets = [0, 128], sizes = [2, 64], strides = [1, 1]} : vector<2x256xf32> to vector<2x64xf32>
    %209 = math.tanh %208 : vector<2x64xf32>
    %210 = vector.extract_strided_slice %195 {offsets = [0, 192], sizes = [2, 64], strides = [1, 1]} : vector<2x256xf32> to vector<2x64xf32>
    %211 = arith.negf %210 : vector<2x64xf32>
    %212 = math.exp %211 : vector<2x64xf32>
    %cst_40 = arith.constant 1.000000e+00 : f32
    %213 = vector.broadcast %cst_40 : f32 to vector<2x64xf32>
    %214 = arith.addf %213, %212 : vector<2x64xf32>
    %215 = arith.divf %213, %214 : vector<2x64xf32>
    %216 = arith.mulf %207, %188 : vector<2x64xf32>
    %217 = arith.mulf %201, %209 : vector<2x64xf32>
    %218 = arith.addf %216, %217 : vector<2x64xf32>
    %219 = math.tanh %218 : vector<2x64xf32>
    %220 = arith.mulf %215, %219 : vector<2x64xf32>
    %221 = vector.extract_strided_slice %5 {offsets = [14, 0], sizes = [2, 256], strides = [1, 1]} : vector<16x256xf32> to vector<2x256xf32>
    %222 = vector.extract_strided_slice %7 {offsets = [0, 0], sizes = [2, 256], strides = [1, 1]} : vector<16x256xf32> to vector<2x256xf32>
    %223 = arith.addf %221, %222 : vector<2x256xf32>
    %cst_41 = arith.constant dense<0.000000e+00> : vector<2x256xf32>
    %224 = tpu.matmul %220, %8, %cst_41 {dimension_numbers = #tpu.dot_dimension_numbers<[1], [0], [0], [1], [0, 0, 1, 1], [], []>} : vector<2x64xf32>, vector<64x256xf32>, vector<2x256xf32> -> vector<2x256xf32>
    %225 = arith.addf %223, %224 : vector<2x256xf32>
    %226 = vector.extract_strided_slice %225 {offsets = [0, 0], sizes = [2, 64], strides = [1, 1]} : vector<2x256xf32> to vector<2x64xf32>
    %227 = arith.negf %226 : vector<2x64xf32>
    %228 = math.exp %227 : vector<2x64xf32>
    %cst_42 = arith.constant 1.000000e+00 : f32
    %229 = vector.broadcast %cst_42 : f32 to vector<2x64xf32>
    %230 = arith.addf %229, %228 : vector<2x64xf32>
    %231 = arith.divf %229, %230 : vector<2x64xf32>
    %232 = vector.extract_strided_slice %225 {offsets = [0, 64], sizes = [2, 64], strides = [1, 1]} : vector<2x256xf32> to vector<2x64xf32>
    %233 = arith.negf %232 : vector<2x64xf32>
    %234 = math.exp %233 : vector<2x64xf32>
    %cst_43 = arith.constant 1.000000e+00 : f32
    %235 = vector.broadcast %cst_43 : f32 to vector<2x64xf32>
    %236 = arith.addf %235, %234 : vector<2x64xf32>
    %237 = arith.divf %235, %236 : vector<2x64xf32>
    %238 = vector.extract_strided_slice %225 {offsets = [0, 128], sizes = [2, 64], strides = [1, 1]} : vector<2x256xf32> to vector<2x64xf32>
    %239 = math.tanh %238 : vector<2x64xf32>
    %240 = vector.extract_strided_slice %225 {offsets = [0, 192], sizes = [2, 64], strides = [1, 1]} : vector<2x256xf32> to vector<2x64xf32>
    %241 = arith.negf %240 : vector<2x64xf32>
    %242 = math.exp %241 : vector<2x64xf32>
    %cst_44 = arith.constant 1.000000e+00 : f32
    %243 = vector.broadcast %cst_44 : f32 to vector<2x64xf32>
    %244 = arith.addf %243, %242 : vector<2x64xf32>
    %245 = arith.divf %243, %244 : vector<2x64xf32>
    %246 = arith.mulf %237, %218 : vector<2x64xf32>
    %247 = arith.mulf %231, %239 : vector<2x64xf32>
    %248 = arith.addf %246, %247 : vector<2x64xf32>
    %249 = math.tanh %248 : vector<2x64xf32>
    %250 = arith.mulf %245, %249 : vector<2x64xf32>
    %251 = tpu.concatenate %40, %70, %100, %130, %160, %190, %220, %250 in 0 : vector<2x64xf32>, vector<2x64xf32>, vector<2x64xf32>, vector<2x64xf32>, vector<2x64xf32>, vector<2x64xf32>, vector<2x64xf32>, vector<2x64xf32> -> vector<16x64xf32>
    %c0_45 = arith.constant 0 : index
    %c0_46 = arith.constant 0 : index
    %252 = vector.load %arg5[%c0_45, %c0_46] : memref<64x256xf32, #tpu.memory_space<vmem>>, vector<64x256xf32>
    %cst_47 = arith.constant dense<0.000000e+00> : vector<16x256xf32>
    %253 = tpu.matmul %251, %252, %cst_47 {dimension_numbers = #tpu.dot_dimension_numbers<[1], [0], [0], [1], [0, 0, 1, 1], [], []>} : vector<16x64xf32>, vector<64x256xf32>, vector<16x256xf32> -> vector<16x256xf32>
    %c0_48 = arith.constant 0 : index
    %c0_49 = arith.constant 0 : index
    %254 = vector.load %arg7[%c0_48, %c0_49] : memref<1x256xf32, #tpu.memory_space<vmem>>, vector<1x256xf32>
    %255 = vector.broadcast %254 : vector<1x256xf32> to vector<16x256xf32>
    %256 = arith.addf %253, %255 : vector<16x256xf32>
    %c0_50 = arith.constant 0 : index
    %c0_51 = arith.constant 0 : index
    %257 = vector.load %arg6[%c0_50, %c0_51] : memref<64x256xf32, #tpu.memory_space<vmem>>, vector<64x256xf32>
    %cst_52 = arith.constant dense<0.000000e+00> : vector<16x256xf32>
    %258 = tpu.matmul %251, %257, %cst_52 {dimension_numbers = #tpu.dot_dimension_numbers<[1], [0], [0], [1], [0, 0, 1, 1], [], []>} : vector<16x64xf32>, vector<64x256xf32>, vector<16x256xf32> -> vector<16x256xf32>
    %259 = vector.extract_strided_slice %256 {offsets = [0, 0], sizes = [2, 256], strides = [1, 1]} : vector<16x256xf32> to vector<2x256xf32>
    %260 = vector.extract_strided_slice %258 {offsets = [14, 0], sizes = [2, 256], strides = [1, 1]} : vector<16x256xf32> to vector<2x256xf32>
    %261 = arith.addf %259, %260 : vector<2x256xf32>
    %cst_53 = arith.constant dense<0.000000e+00> : vector<2x256xf32>
    %262 = tpu.matmul %10, %9, %cst_53 {dimension_numbers = #tpu.dot_dimension_numbers<[1], [0], [0], [1], [0, 0, 1, 1], [], []>} : vector<2x64xf32>, vector<64x256xf32>, vector<2x256xf32> -> vector<2x256xf32>
    %263 = arith.addf %261, %262 : vector<2x256xf32>
    %264 = vector.extract_strided_slice %263 {offsets = [0, 0], sizes = [2, 64], strides = [1, 1]} : vector<2x256xf32> to vector<2x64xf32>
    %265 = arith.negf %264 : vector<2x64xf32>
    %266 = math.exp %265 : vector<2x64xf32>
    %cst_54 = arith.constant 1.000000e+00 : f32
    %267 = vector.broadcast %cst_54 : f32 to vector<2x64xf32>
    %268 = arith.addf %267, %266 : vector<2x64xf32>
    %269 = arith.divf %267, %268 : vector<2x64xf32>
    %270 = vector.extract_strided_slice %263 {offsets = [0, 64], sizes = [2, 64], strides = [1, 1]} : vector<2x256xf32> to vector<2x64xf32>
    %271 = arith.negf %270 : vector<2x64xf32>
    %272 = math.exp %271 : vector<2x64xf32>
    %cst_55 = arith.constant 1.000000e+00 : f32
    %273 = vector.broadcast %cst_55 : f32 to vector<2x64xf32>
    %274 = arith.addf %273, %272 : vector<2x64xf32>
    %275 = arith.divf %273, %274 : vector<2x64xf32>
    %276 = vector.extract_strided_slice %263 {offsets = [0, 128], sizes = [2, 64], strides = [1, 1]} : vector<2x256xf32> to vector<2x64xf32>
    %277 = math.tanh %276 : vector<2x64xf32>
    %278 = vector.extract_strided_slice %263 {offsets = [0, 192], sizes = [2, 64], strides = [1, 1]} : vector<2x256xf32> to vector<2x64xf32>
    %279 = arith.negf %278 : vector<2x64xf32>
    %280 = math.exp %279 : vector<2x64xf32>
    %cst_56 = arith.constant 1.000000e+00 : f32
    %281 = vector.broadcast %cst_56 : f32 to vector<2x64xf32>
    %282 = arith.addf %281, %280 : vector<2x64xf32>
    %283 = arith.divf %281, %282 : vector<2x64xf32>
    %284 = arith.mulf %275, %10 : vector<2x64xf32>
    %285 = arith.mulf %269, %277 : vector<2x64xf32>
    %286 = arith.addf %284, %285 : vector<2x64xf32>
    %287 = math.tanh %286 : vector<2x64xf32>
    %288 = arith.mulf %283, %287 : vector<2x64xf32>
    %289 = vector.extract_strided_slice %256 {offsets = [2, 0], sizes = [2, 256], strides = [1, 1]} : vector<16x256xf32> to vector<2x256xf32>
    %290 = vector.extract_strided_slice %258 {offsets = [12, 0], sizes = [2, 256], strides = [1, 1]} : vector<16x256xf32> to vector<2x256xf32>
    %291 = arith.addf %289, %290 : vector<2x256xf32>
    %cst_57 = arith.constant dense<0.000000e+00> : vector<2x256xf32>
    %292 = tpu.matmul %288, %9, %cst_57 {dimension_numbers = #tpu.dot_dimension_numbers<[1], [0], [0], [1], [0, 0, 1, 1], [], []>} : vector<2x64xf32>, vector<64x256xf32>, vector<2x256xf32> -> vector<2x256xf32>
    %293 = arith.addf %291, %292 : vector<2x256xf32>
    %294 = vector.extract_strided_slice %293 {offsets = [0, 0], sizes = [2, 64], strides = [1, 1]} : vector<2x256xf32> to vector<2x64xf32>
    %295 = arith.negf %294 : vector<2x64xf32>
    %296 = math.exp %295 : vector<2x64xf32>
    %cst_58 = arith.constant 1.000000e+00 : f32
    %297 = vector.broadcast %cst_58 : f32 to vector<2x64xf32>
    %298 = arith.addf %297, %296 : vector<2x64xf32>
    %299 = arith.divf %297, %298 : vector<2x64xf32>
    %300 = vector.extract_strided_slice %293 {offsets = [0, 64], sizes = [2, 64], strides = [1, 1]} : vector<2x256xf32> to vector<2x64xf32>
    %301 = arith.negf %300 : vector<2x64xf32>
    %302 = math.exp %301 : vector<2x64xf32>
    %cst_59 = arith.constant 1.000000e+00 : f32
    %303 = vector.broadcast %cst_59 : f32 to vector<2x64xf32>
    %304 = arith.addf %303, %302 : vector<2x64xf32>
    %305 = arith.divf %303, %304 : vector<2x64xf32>
    %306 = vector.extract_strided_slice %293 {offsets = [0, 128], sizes = [2, 64], strides = [1, 1]} : vector<2x256xf32> to vector<2x64xf32>
    %307 = math.tanh %306 : vector<2x64xf32>
    %308 = vector.extract_strided_slice %293 {offsets = [0, 192], sizes = [2, 64], strides = [1, 1]} : vector<2x256xf32> to vector<2x64xf32>
    %309 = arith.negf %308 : vector<2x64xf32>
    %310 = math.exp %309 : vector<2x64xf32>
    %cst_60 = arith.constant 1.000000e+00 : f32
    %311 = vector.broadcast %cst_60 : f32 to vector<2x64xf32>
    %312 = arith.addf %311, %310 : vector<2x64xf32>
    %313 = arith.divf %311, %312 : vector<2x64xf32>
    %314 = arith.mulf %305, %286 : vector<2x64xf32>
    %315 = arith.mulf %299, %307 : vector<2x64xf32>
    %316 = arith.addf %314, %315 : vector<2x64xf32>
    %317 = math.tanh %316 : vector<2x64xf32>
    %318 = arith.mulf %313, %317 : vector<2x64xf32>
    %319 = vector.extract_strided_slice %256 {offsets = [4, 0], sizes = [2, 256], strides = [1, 1]} : vector<16x256xf32> to vector<2x256xf32>
    %320 = vector.extract_strided_slice %258 {offsets = [10, 0], sizes = [2, 256], strides = [1, 1]} : vector<16x256xf32> to vector<2x256xf32>
    %321 = arith.addf %319, %320 : vector<2x256xf32>
    %cst_61 = arith.constant dense<0.000000e+00> : vector<2x256xf32>
    %322 = tpu.matmul %318, %9, %cst_61 {dimension_numbers = #tpu.dot_dimension_numbers<[1], [0], [0], [1], [0, 0, 1, 1], [], []>} : vector<2x64xf32>, vector<64x256xf32>, vector<2x256xf32> -> vector<2x256xf32>
    %323 = arith.addf %321, %322 : vector<2x256xf32>
    %324 = vector.extract_strided_slice %323 {offsets = [0, 0], sizes = [2, 64], strides = [1, 1]} : vector<2x256xf32> to vector<2x64xf32>
    %325 = arith.negf %324 : vector<2x64xf32>
    %326 = math.exp %325 : vector<2x64xf32>
    %cst_62 = arith.constant 1.000000e+00 : f32
    %327 = vector.broadcast %cst_62 : f32 to vector<2x64xf32>
    %328 = arith.addf %327, %326 : vector<2x64xf32>
    %329 = arith.divf %327, %328 : vector<2x64xf32>
    %330 = vector.extract_strided_slice %323 {offsets = [0, 64], sizes = [2, 64], strides = [1, 1]} : vector<2x256xf32> to vector<2x64xf32>
    %331 = arith.negf %330 : vector<2x64xf32>
    %332 = math.exp %331 : vector<2x64xf32>
    %cst_63 = arith.constant 1.000000e+00 : f32
    %333 = vector.broadcast %cst_63 : f32 to vector<2x64xf32>
    %334 = arith.addf %333, %332 : vector<2x64xf32>
    %335 = arith.divf %333, %334 : vector<2x64xf32>
    %336 = vector.extract_strided_slice %323 {offsets = [0, 128], sizes = [2, 64], strides = [1, 1]} : vector<2x256xf32> to vector<2x64xf32>
    %337 = math.tanh %336 : vector<2x64xf32>
    %338 = vector.extract_strided_slice %323 {offsets = [0, 192], sizes = [2, 64], strides = [1, 1]} : vector<2x256xf32> to vector<2x64xf32>
    %339 = arith.negf %338 : vector<2x64xf32>
    %340 = math.exp %339 : vector<2x64xf32>
    %cst_64 = arith.constant 1.000000e+00 : f32
    %341 = vector.broadcast %cst_64 : f32 to vector<2x64xf32>
    %342 = arith.addf %341, %340 : vector<2x64xf32>
    %343 = arith.divf %341, %342 : vector<2x64xf32>
    %344 = arith.mulf %335, %316 : vector<2x64xf32>
    %345 = arith.mulf %329, %337 : vector<2x64xf32>
    %346 = arith.addf %344, %345 : vector<2x64xf32>
    %347 = math.tanh %346 : vector<2x64xf32>
    %348 = arith.mulf %343, %347 : vector<2x64xf32>
    %349 = vector.extract_strided_slice %256 {offsets = [6, 0], sizes = [2, 256], strides = [1, 1]} : vector<16x256xf32> to vector<2x256xf32>
    %350 = vector.extract_strided_slice %258 {offsets = [8, 0], sizes = [2, 256], strides = [1, 1]} : vector<16x256xf32> to vector<2x256xf32>
    %351 = arith.addf %349, %350 : vector<2x256xf32>
    %cst_65 = arith.constant dense<0.000000e+00> : vector<2x256xf32>
    %352 = tpu.matmul %348, %9, %cst_65 {dimension_numbers = #tpu.dot_dimension_numbers<[1], [0], [0], [1], [0, 0, 1, 1], [], []>} : vector<2x64xf32>, vector<64x256xf32>, vector<2x256xf32> -> vector<2x256xf32>
    %353 = arith.addf %351, %352 : vector<2x256xf32>
    %354 = vector.extract_strided_slice %353 {offsets = [0, 0], sizes = [2, 64], strides = [1, 1]} : vector<2x256xf32> to vector<2x64xf32>
    %355 = arith.negf %354 : vector<2x64xf32>
    %356 = math.exp %355 : vector<2x64xf32>
    %cst_66 = arith.constant 1.000000e+00 : f32
    %357 = vector.broadcast %cst_66 : f32 to vector<2x64xf32>
    %358 = arith.addf %357, %356 : vector<2x64xf32>
    %359 = arith.divf %357, %358 : vector<2x64xf32>
    %360 = vector.extract_strided_slice %353 {offsets = [0, 64], sizes = [2, 64], strides = [1, 1]} : vector<2x256xf32> to vector<2x64xf32>
    %361 = arith.negf %360 : vector<2x64xf32>
    %362 = math.exp %361 : vector<2x64xf32>
    %cst_67 = arith.constant 1.000000e+00 : f32
    %363 = vector.broadcast %cst_67 : f32 to vector<2x64xf32>
    %364 = arith.addf %363, %362 : vector<2x64xf32>
    %365 = arith.divf %363, %364 : vector<2x64xf32>
    %366 = vector.extract_strided_slice %353 {offsets = [0, 128], sizes = [2, 64], strides = [1, 1]} : vector<2x256xf32> to vector<2x64xf32>
    %367 = math.tanh %366 : vector<2x64xf32>
    %368 = vector.extract_strided_slice %353 {offsets = [0, 192], sizes = [2, 64], strides = [1, 1]} : vector<2x256xf32> to vector<2x64xf32>
    %369 = arith.negf %368 : vector<2x64xf32>
    %370 = math.exp %369 : vector<2x64xf32>
    %cst_68 = arith.constant 1.000000e+00 : f32
    %371 = vector.broadcast %cst_68 : f32 to vector<2x64xf32>
    %372 = arith.addf %371, %370 : vector<2x64xf32>
    %373 = arith.divf %371, %372 : vector<2x64xf32>
    %374 = arith.mulf %365, %346 : vector<2x64xf32>
    %375 = arith.mulf %359, %367 : vector<2x64xf32>
    %376 = arith.addf %374, %375 : vector<2x64xf32>
    %377 = math.tanh %376 : vector<2x64xf32>
    %378 = arith.mulf %373, %377 : vector<2x64xf32>
    %379 = vector.extract_strided_slice %256 {offsets = [8, 0], sizes = [2, 256], strides = [1, 1]} : vector<16x256xf32> to vector<2x256xf32>
    %380 = vector.extract_strided_slice %258 {offsets = [6, 0], sizes = [2, 256], strides = [1, 1]} : vector<16x256xf32> to vector<2x256xf32>
    %381 = arith.addf %379, %380 : vector<2x256xf32>
    %cst_69 = arith.constant dense<0.000000e+00> : vector<2x256xf32>
    %382 = tpu.matmul %378, %9, %cst_69 {dimension_numbers = #tpu.dot_dimension_numbers<[1], [0], [0], [1], [0, 0, 1, 1], [], []>} : vector<2x64xf32>, vector<64x256xf32>, vector<2x256xf32> -> vector<2x256xf32>
    %383 = arith.addf %381, %382 : vector<2x256xf32>
    %384 = vector.extract_strided_slice %383 {offsets = [0, 0], sizes = [2, 64], strides = [1, 1]} : vector<2x256xf32> to vector<2x64xf32>
    %385 = arith.negf %384 : vector<2x64xf32>
    %386 = math.exp %385 : vector<2x64xf32>
    %cst_70 = arith.constant 1.000000e+00 : f32
    %387 = vector.broadcast %cst_70 : f32 to vector<2x64xf32>
    %388 = arith.addf %387, %386 : vector<2x64xf32>
    %389 = arith.divf %387, %388 : vector<2x64xf32>
    %390 = vector.extract_strided_slice %383 {offsets = [0, 64], sizes = [2, 64], strides = [1, 1]} : vector<2x256xf32> to vector<2x64xf32>
    %391 = arith.negf %390 : vector<2x64xf32>
    %392 = math.exp %391 : vector<2x64xf32>
    %cst_71 = arith.constant 1.000000e+00 : f32
    %393 = vector.broadcast %cst_71 : f32 to vector<2x64xf32>
    %394 = arith.addf %393, %392 : vector<2x64xf32>
    %395 = arith.divf %393, %394 : vector<2x64xf32>
    %396 = vector.extract_strided_slice %383 {offsets = [0, 128], sizes = [2, 64], strides = [1, 1]} : vector<2x256xf32> to vector<2x64xf32>
    %397 = math.tanh %396 : vector<2x64xf32>
    %398 = vector.extract_strided_slice %383 {offsets = [0, 192], sizes = [2, 64], strides = [1, 1]} : vector<2x256xf32> to vector<2x64xf32>
    %399 = arith.negf %398 : vector<2x64xf32>
    %400 = math.exp %399 : vector<2x64xf32>
    %cst_72 = arith.constant 1.000000e+00 : f32
    %401 = vector.broadcast %cst_72 : f32 to vector<2x64xf32>
    %402 = arith.addf %401, %400 : vector<2x64xf32>
    %403 = arith.divf %401, %402 : vector<2x64xf32>
    %404 = arith.mulf %395, %376 : vector<2x64xf32>
    %405 = arith.mulf %389, %397 : vector<2x64xf32>
    %406 = arith.addf %404, %405 : vector<2x64xf32>
    %407 = math.tanh %406 : vector<2x64xf32>
    %408 = arith.mulf %403, %407 : vector<2x64xf32>
    %409 = vector.extract_strided_slice %256 {offsets = [10, 0], sizes = [2, 256], strides = [1, 1]} : vector<16x256xf32> to vector<2x256xf32>
    %410 = vector.extract_strided_slice %258 {offsets = [4, 0], sizes = [2, 256], strides = [1, 1]} : vector<16x256xf32> to vector<2x256xf32>
    %411 = arith.addf %409, %410 : vector<2x256xf32>
    %cst_73 = arith.constant dense<0.000000e+00> : vector<2x256xf32>
    %412 = tpu.matmul %408, %9, %cst_73 {dimension_numbers = #tpu.dot_dimension_numbers<[1], [0], [0], [1], [0, 0, 1, 1], [], []>} : vector<2x64xf32>, vector<64x256xf32>, vector<2x256xf32> -> vector<2x256xf32>
    %413 = arith.addf %411, %412 : vector<2x256xf32>
    %414 = vector.extract_strided_slice %413 {offsets = [0, 0], sizes = [2, 64], strides = [1, 1]} : vector<2x256xf32> to vector<2x64xf32>
    %415 = arith.negf %414 : vector<2x64xf32>
    %416 = math.exp %415 : vector<2x64xf32>
    %cst_74 = arith.constant 1.000000e+00 : f32
    %417 = vector.broadcast %cst_74 : f32 to vector<2x64xf32>
    %418 = arith.addf %417, %416 : vector<2x64xf32>
    %419 = arith.divf %417, %418 : vector<2x64xf32>
    %420 = vector.extract_strided_slice %413 {offsets = [0, 64], sizes = [2, 64], strides = [1, 1]} : vector<2x256xf32> to vector<2x64xf32>
    %421 = arith.negf %420 : vector<2x64xf32>
    %422 = math.exp %421 : vector<2x64xf32>
    %cst_75 = arith.constant 1.000000e+00 : f32
    %423 = vector.broadcast %cst_75 : f32 to vector<2x64xf32>
    %424 = arith.addf %423, %422 : vector<2x64xf32>
    %425 = arith.divf %423, %424 : vector<2x64xf32>
    %426 = vector.extract_strided_slice %413 {offsets = [0, 128], sizes = [2, 64], strides = [1, 1]} : vector<2x256xf32> to vector<2x64xf32>
    %427 = math.tanh %426 : vector<2x64xf32>
    %428 = vector.extract_strided_slice %413 {offsets = [0, 192], sizes = [2, 64], strides = [1, 1]} : vector<2x256xf32> to vector<2x64xf32>
    %429 = arith.negf %428 : vector<2x64xf32>
    %430 = math.exp %429 : vector<2x64xf32>
    %cst_76 = arith.constant 1.000000e+00 : f32
    %431 = vector.broadcast %cst_76 : f32 to vector<2x64xf32>
    %432 = arith.addf %431, %430 : vector<2x64xf32>
    %433 = arith.divf %431, %432 : vector<2x64xf32>
    %434 = arith.mulf %425, %406 : vector<2x64xf32>
    %435 = arith.mulf %419, %427 : vector<2x64xf32>
    %436 = arith.addf %434, %435 : vector<2x64xf32>
    %437 = math.tanh %436 : vector<2x64xf32>
    %438 = arith.mulf %433, %437 : vector<2x64xf32>
    %439 = vector.extract_strided_slice %256 {offsets = [12, 0], sizes = [2, 256], strides = [1, 1]} : vector<16x256xf32> to vector<2x256xf32>
    %440 = vector.extract_strided_slice %258 {offsets = [2, 0], sizes = [2, 256], strides = [1, 1]} : vector<16x256xf32> to vector<2x256xf32>
    %441 = arith.addf %439, %440 : vector<2x256xf32>
    %cst_77 = arith.constant dense<0.000000e+00> : vector<2x256xf32>
    %442 = tpu.matmul %438, %9, %cst_77 {dimension_numbers = #tpu.dot_dimension_numbers<[1], [0], [0], [1], [0, 0, 1, 1], [], []>} : vector<2x64xf32>, vector<64x256xf32>, vector<2x256xf32> -> vector<2x256xf32>
    %443 = arith.addf %441, %442 : vector<2x256xf32>
    %444 = vector.extract_strided_slice %443 {offsets = [0, 0], sizes = [2, 64], strides = [1, 1]} : vector<2x256xf32> to vector<2x64xf32>
    %445 = arith.negf %444 : vector<2x64xf32>
    %446 = math.exp %445 : vector<2x64xf32>
    %cst_78 = arith.constant 1.000000e+00 : f32
    %447 = vector.broadcast %cst_78 : f32 to vector<2x64xf32>
    %448 = arith.addf %447, %446 : vector<2x64xf32>
    %449 = arith.divf %447, %448 : vector<2x64xf32>
    %450 = vector.extract_strided_slice %443 {offsets = [0, 64], sizes = [2, 64], strides = [1, 1]} : vector<2x256xf32> to vector<2x64xf32>
    %451 = arith.negf %450 : vector<2x64xf32>
    %452 = math.exp %451 : vector<2x64xf32>
    %cst_79 = arith.constant 1.000000e+00 : f32
    %453 = vector.broadcast %cst_79 : f32 to vector<2x64xf32>
    %454 = arith.addf %453, %452 : vector<2x64xf32>
    %455 = arith.divf %453, %454 : vector<2x64xf32>
    %456 = vector.extract_strided_slice %443 {offsets = [0, 128], sizes = [2, 64], strides = [1, 1]} : vector<2x256xf32> to vector<2x64xf32>
    %457 = math.tanh %456 : vector<2x64xf32>
    %458 = vector.extract_strided_slice %443 {offsets = [0, 192], sizes = [2, 64], strides = [1, 1]} : vector<2x256xf32> to vector<2x64xf32>
    %459 = arith.negf %458 : vector<2x64xf32>
    %460 = math.exp %459 : vector<2x64xf32>
    %cst_80 = arith.constant 1.000000e+00 : f32
    %461 = vector.broadcast %cst_80 : f32 to vector<2x64xf32>
    %462 = arith.addf %461, %460 : vector<2x64xf32>
    %463 = arith.divf %461, %462 : vector<2x64xf32>
    %464 = arith.mulf %455, %436 : vector<2x64xf32>
    %465 = arith.mulf %449, %457 : vector<2x64xf32>
    %466 = arith.addf %464, %465 : vector<2x64xf32>
    %467 = math.tanh %466 : vector<2x64xf32>
    %468 = arith.mulf %463, %467 : vector<2x64xf32>
    %469 = vector.extract_strided_slice %256 {offsets = [14, 0], sizes = [2, 256], strides = [1, 1]} : vector<16x256xf32> to vector<2x256xf32>
    %470 = vector.extract_strided_slice %258 {offsets = [0, 0], sizes = [2, 256], strides = [1, 1]} : vector<16x256xf32> to vector<2x256xf32>
    %471 = arith.addf %469, %470 : vector<2x256xf32>
    %cst_81 = arith.constant dense<0.000000e+00> : vector<2x256xf32>
    %472 = tpu.matmul %468, %9, %cst_81 {dimension_numbers = #tpu.dot_dimension_numbers<[1], [0], [0], [1], [0, 0, 1, 1], [], []>} : vector<2x64xf32>, vector<64x256xf32>, vector<2x256xf32> -> vector<2x256xf32>
    %473 = arith.addf %471, %472 : vector<2x256xf32>
    %474 = vector.extract_strided_slice %473 {offsets = [0, 0], sizes = [2, 64], strides = [1, 1]} : vector<2x256xf32> to vector<2x64xf32>
    %475 = arith.negf %474 : vector<2x64xf32>
    %476 = math.exp %475 : vector<2x64xf32>
    %cst_82 = arith.constant 1.000000e+00 : f32
    %477 = vector.broadcast %cst_82 : f32 to vector<2x64xf32>
    %478 = arith.addf %477, %476 : vector<2x64xf32>
    %479 = arith.divf %477, %478 : vector<2x64xf32>
    %480 = vector.extract_strided_slice %473 {offsets = [0, 64], sizes = [2, 64], strides = [1, 1]} : vector<2x256xf32> to vector<2x64xf32>
    %481 = arith.negf %480 : vector<2x64xf32>
    %482 = math.exp %481 : vector<2x64xf32>
    %cst_83 = arith.constant 1.000000e+00 : f32
    %483 = vector.broadcast %cst_83 : f32 to vector<2x64xf32>
    %484 = arith.addf %483, %482 : vector<2x64xf32>
    %485 = arith.divf %483, %484 : vector<2x64xf32>
    %486 = vector.extract_strided_slice %473 {offsets = [0, 128], sizes = [2, 64], strides = [1, 1]} : vector<2x256xf32> to vector<2x64xf32>
    %487 = math.tanh %486 : vector<2x64xf32>
    %488 = vector.extract_strided_slice %473 {offsets = [0, 192], sizes = [2, 64], strides = [1, 1]} : vector<2x256xf32> to vector<2x64xf32>
    %489 = arith.negf %488 : vector<2x64xf32>
    %490 = math.exp %489 : vector<2x64xf32>
    %cst_84 = arith.constant 1.000000e+00 : f32
    %491 = vector.broadcast %cst_84 : f32 to vector<2x64xf32>
    %492 = arith.addf %491, %490 : vector<2x64xf32>
    %493 = arith.divf %491, %492 : vector<2x64xf32>
    %494 = arith.mulf %485, %466 : vector<2x64xf32>
    %495 = arith.mulf %479, %487 : vector<2x64xf32>
    %496 = arith.addf %494, %495 : vector<2x64xf32>
    %497 = math.tanh %496 : vector<2x64xf32>
    %498 = arith.mulf %493, %497 : vector<2x64xf32>
    %c0_85 = arith.constant 0 : index
    %c0_86 = arith.constant 0 : index
    %499 = vector.load %arg9[%c0_85, %c0_86] : memref<64x8xf32, #tpu.memory_space<vmem>>, vector<64x8xf32>
    %cst_87 = arith.constant dense<0.000000e+00> : vector<2x8xf32>
    %500 = tpu.matmul %498, %499, %cst_87 {dimension_numbers = #tpu.dot_dimension_numbers<[1], [0], [0], [1], [0, 0, 1, 1], [], []>} : vector<2x64xf32>, vector<64x8xf32>, vector<2x8xf32> -> vector<2x8xf32>
    %c0_88 = arith.constant 0 : index
    %c0_89 = arith.constant 0 : index
    %501 = vector.load %arg10[%c0_88, %c0_89] : memref<1x8xf32, #tpu.memory_space<vmem>>, vector<1x8xf32>
    %502 = vector.broadcast %501 : vector<1x8xf32> to vector<2x8xf32>
    %503 = arith.addf %500, %502 : vector<2x8xf32>
    %c0_90 = arith.constant 0 : index
    %c0_91 = arith.constant 0 : index
    %504 = vector.load %arg11[%c0_90, %c0_91] : memref<2x8xf32, #tpu.memory_space<vmem>>, vector<2x8xf32>
    tpu.vector_store %arg11[%c0_90, %c0_91], %503 {strides = array<i32>} : memref<2x8xf32, #tpu.memory_space<vmem>>, vector<2x8xf32>,
    return
  }
}

</mosaic_0001>

<bundles_post_ra>
// kernel: main_model_forward.1
= control target key start
LH: loop header
LB: loop body
LE: loop exit
PB: predicated region body
PF: predicated region fallthrough
CT: control target
= control target key end

     0   :  { %16 = vsyncpa [#allocation3], 0  ;;  %s3593_s0 = inlined_call_operand.vmem [shape: f32[16,128], index: 0, kind: input, shape index: {}]   ;;  %s3594_s1 = inlined_call_operand.hbm [shape: f32[128,256], index: 1, kind: input, shape index: {}]   ;;  %s3595_s2 = inlined_call_operand.hbm [shape: f32[128,256], index: 2, kind: input, shape index: {}]   ;;  %s3596_s3 = inlined_call_operand.vmem [shape: f32[1,256], index: 3, kind: input, shape index: {}]   ;;  %s3597_s4 = inlined_call_operand.hbm [shape: f32[64,256], index: 4, kind: input, shape index: {}]   ;;  %s3598_s5 = inlined_call_operand.hbm [shape: f32[64,256], index: 5, kind: input, shape index: {}]   ;;  %s3599_s6 = inlined_call_operand.hbm [shape: f32[64,256], index: 6, kind: input, shape index: {}]   ;;  %s3600_s7 = inlined_call_operand.vmem [shape: f32[1,256], index: 7, kind: input, shape index: {}]   ;;  %s3601_s8 = inlined_call_operand.hbm [shape: f32[64,256], index: 8, kind: input, shape index: {}]   ;;  %s3602_s9 = inlined_call_operand.vmem [shape: f32[64,8], index: 9, kind: input, shape index: {}]   ;;  %s3603_s10 = inlined_call_operand.vmem [shape: f32[1,8], index: 10, kind: input, shape index: {}]   ;;  %s3604_s11 = inlined_call_operand.hbm [shape: f32[2,8], index: 11, kind: output, shape index: {}]  }
   0x1   :  { %17 = vsyncpa [#allocation6], 0 }
   0x2   :  { %18 = vsyncpa [#allocation9], 0 }
   0x3   :  { %19 = vsyncpa [#allocation12], 0 }
   0x4   :  { %20 = vsyncpa [#allocation4], 0  ;;  %s2921_s17 = smov [#allocation5]   ;;  %s2922_s19 = smov [#allocation8]  }
   0x5   :  { %s40_s18 = sshll.u32 %s2921_s17, 4  ;;  %s66_s20 = sshll.u32 %s2922_s19, 4  ;;  %s41_s18 = int_to_ptr.vmem [resolvable:$true] %s40_s18  ;;  %s67_s20 = int_to_ptr.vmem [resolvable:$true] %s66_s20 }
   0x6   :  { %s2779_s21 = scalar_lea.vmem %s41_s18, 4096  ;;  %p2784_p1 = scmp.lt.s32.totalorder %s41_s18, %s41_s18 }
   0x7   :  { %p2780_p0 = scmp.ne.s32.totalorder %s41_s18, %s2779_s21  ;;  %p2785_p2 = scmp.lt.s32.totalorder %s2779_s21, %s2779_s21 }
   0x9   :  { %p2786_p3 = por %p2785_p2, %p2784_p1 }
   0xb   :  { %p2787_p4 = pnand %p2786_p3, %p2780_p0 }
   0xd   :  { %2790 = shalt.err (!%p2787_p4)
}
   0xe   :  { %s2923_s22 = smov 256   ;;  %s2924_s23 = smov 16  }
   0xf   :  { %46 = dma.hbm_to_vmem [thread:$0]  %s3595_s2, 4096, %s41_s18, [#allocation6], %s2923_s22, %s2923_s22, %s2924_s23  }
  0x10   :  { %s2799_s26 = scalar_lea.vmem %s67_s20, 2048  ;;  %p2804_p6 = scmp.lt.s32.totalorder %s67_s20, %s67_s20 }
  0x11   :  { %p2800_p5 = scmp.ne.s32.totalorder %s67_s20, %s2799_s26  ;;  %p2805_p7 = scmp.lt.s32.totalorder %s2799_s26, %s2799_s26 }
  0x13   :  { %p2806_p8 = por %p2805_p7, %p2804_p6 }
  0x15   :  { %p2807_p9 = pnand %p2806_p8, %p2800_p5 }
  0x17   :  { %2810 = shalt.err (!%p2807_p9)
}
  0x18   :  { %72 = dma.hbm_to_vmem [thread:$0]  %s3598_s5, 2048, %s67_s20, [#allocation9], %s2923_s22, %s2923_s22, %s2924_s23  }
  0x19   :  { %s2925_s29 = smov [#allocation2]   ;;  %s2926_s12 = smov [#allocation7]  }
  0x1a   :  { %s28_s30 = sshll.u32 %s2925_s29, 4  ;;  %s54_s13 = sshll.u32 %s2926_s12, 4  ;;  %s29_s30 = int_to_ptr.vmem [resolvable:$true] %s28_s30  ;;  %s55_s13 = int_to_ptr.vmem [resolvable:$true] %s54_s13 }
  0x1b   :  { %s2819_s2 = scalar_lea.vmem %s29_s30, 4096  ;;  %p2824_p11 = scmp.lt.s32.totalorder %s29_s30, %s29_s30 }
  0x1c   :  { %p2820_p10 = scmp.ne.s32.totalorder %s29_s30, %s2819_s2  ;;  %p2825_p12 = scmp.lt.s32.totalorder %s2819_s2, %s2819_s2 }
  0x1e   :  { %p2826_p13 = por %p2825_p12, %p2824_p11 }
  0x20   :  { %p2827_p0 = pnand %p2826_p13, %p2820_p10 }
  0x22   :  { %2830 = shalt.err (!%p2827_p0)
}
  0x23   :  { %34 = dma.hbm_to_vmem [thread:$0]  %s3594_s1, 4096, %s29_s30, [#allocation3], %s2923_s22, %s2923_s22, %s2924_s23  }
  0x24   :  { %s2839_s5 = scalar_lea.vmem %s55_s13, 2048  ;;  %p2844_p2 = scmp.lt.s32.totalorder %s55_s13, %s55_s13 }
  0x25   :  { %p2840_p1 = scmp.ne.s32.totalorder %s55_s13, %s2839_s5  ;;  %p2845_p3 = scmp.lt.s32.totalorder %s2839_s5, %s2839_s5 }
  0x27   :  { %p2846_p4 = por %p2845_p3, %p2844_p2 }
  0x29   :  { %p2847_p5 = pnand %p2846_p4, %p2840_p1 }
  0x2b   :  { %2850 = shalt.err (!%p2847_p5)
}
  0x2c   :  { %60 = dma.hbm_to_vmem [thread:$0]  %s3597_s4, 2048, %s55_s13, [#allocation6], %s2923_s22, %s2923_s22, %s2924_s23  }
  0x2d   :  { %s2927_s18 = smov [#allocation10]   ;;  %s2928_s20 = smov [#allocation11]  }
  0x2e   :  { %s78_s19 = sshll.u32 %s2927_s18, 4  ;;  %s92_s21 = sshll.u32 %s2928_s20, 4  ;;  %s79_s19 = int_to_ptr.vmem [resolvable:$true] %s78_s19  ;;  %s93_s21 = int_to_ptr.vmem [resolvable:$true] %s92_s21 }
  0x2f   :  { %s2859_s1 = scalar_lea.vmem %s79_s19, 2048  ;;  %p2864_p7 = scmp.lt.s32.totalorder %s79_s19, %s79_s19 }
  0x30   :  { %p2860_p6 = scmp.ne.s32.totalorder %s79_s19, %s2859_s1  ;;  %p2865_p8 = scmp.lt.s32.totalorder %s2859_s1, %s2859_s1 }
  0x32   :  { %p2866_p9 = por %p2865_p8, %p2864_p7 }
  0x34   :  { %p2867_p10 = pnand %p2866_p9, %p2860_p6 }
  0x36   :  { %2870 = shalt.err (!%p2867_p10)
}
  0x37   :  { %84 = dma.hbm_to_vmem [thread:$0]  %s3599_s6, 2048, %s79_s19, [#allocation9], %s2923_s22, %s2923_s22, %s2924_s23  }
  0x38   :  { %s2879_s4 = scalar_lea.vmem %s93_s21, 2048  ;;  %p2884_p12 = scmp.lt.s32.totalorder %s93_s21, %s93_s21 }
  0x39   :  { %p2880_p11 = scmp.ne.s32.totalorder %s93_s21, %s2879_s4  ;;  %p2885_p13 = scmp.lt.s32.totalorder %s2879_s4, %s2879_s4 }
  0x3b   :  { %p2886_p0 = por %p2885_p13, %p2884_p12 }
  0x3d   :  { %p2887_p1 = pnand %p2886_p0, %p2880_p11 }
  0x3f   :  { %2890 = shalt.err (!%p2887_p1)
}
  0x40   :  { %98 = dma.hbm_to_vmem [thread:$0]  %s3601_s8, 2048, %s93_s21, [#allocation12], %s2923_s22, %s2923_s22, %s2924_s23  }
  0x41   :  { %2911 = dma.done.wait [#allocation3], 4096  }
  0x42   :  { %2912 = vsyncadd [#allocation3], 4294963200 }
  0x43   :  { %2913 = dma.done.wait [#allocation6], 6144  }
  0x44   :  { %2914 = vsyncadd [#allocation6], 4294961152 }
  0x45   :  { %2915 = dma.done.wait [#allocation9], 4096  }
  0x46   :  { %2916 = vsyncadd [#allocation9], 4294963200 }
  0x47   :  { %2917 = dma.done.wait [#allocation12], 2048  }
  0x48   :  { %2918 = vsyncadd [#allocation12], 4294965248  ;;  %v2929_v0 = vmov 0.0   ;;  %v154_v1 = vld [vmem:[#allocation2 + $0xf8] sm:$0xff]  ;;  %v153_v3 = vld [vmem:[#allocation2 + $0xf0] sm:$0xff]  ;;  %vm393_vm0 = vcmask 523264  }
  0x49   :  { %231 = vmatprep.mubr.f32.mxu0 %v2929_v0  ;;  %340 = vmatprep.mubr.f32.mxu1 %v2929_v0  ;;  %v275_v2 = vld [vmem:[#allocation5 + $0xf8] sm:$0xff]  ;;  %v274_v4 = vld [vmem:[#allocation5 + $0xf0] sm:$0xff]  ;;  %v152_v5 = vld [vmem:[#allocation2 + $0xe8] sm:$0xff]  ;;  %vm1274_vm1 = vcmask 1041408   ;;  %vm1276_vm2 = vcmask 1043456   ;;  %vm1278_vm3 = vcmask 1045504  }
  0x4a   :  { %167 = vmatprep.subr.mxu0 %v154_v1  ;;  %276 = vmatprep.subr.mxu1 %v275_v2  ;;  %v273_v6 = vld [vmem:[#allocation5 + $0xe8] sm:$0xff]  ;;  %v151_v7 = vld [vmem:[#allocation2 + $0xe0] sm:$0xff]  ;;  %v150_v9 = vld [vmem:[#allocation2 + $0xd8] sm:$0xff]  ;;  %vm2931_vm4 = vmmov 0   ;;  %s2932_s26 = smov [#allocation13]   ;;  %vm2467_vm5 = vcmask 58368  }
  0x4b   :  { %168 = vmatpush1.msra.mxu0 %v153_v3  ;;  %277 = vmatpush1.msra.mxu1 %v274_v4  ;;  %v272_v8 = vld [vmem:[#allocation5 + $0xe0] sm:$0xff]  ;;  %v271_v10 = vld [vmem:[#allocation5 + $0xd8] sm:$0xff]  ;;  %v149_v11 = vld [vmem:[#allocation2 + $0xd0] sm:$0xff]  ;;  %s2475_s27 = sshll.u32 %s2932_s26, 4  ;;  %s2476_s27 = int_to_ptr.vmem [resolvable:$true] %s2475_s27 }
  0x4c   :  { %169 = vmatprep.subr.mxu0 %v152_v5  ;;  %278 = vmatprep.subr.mxu1 %v273_v6  ;;  %v270_v12 = vld [vmem:[#allocation5 + $0xd0] sm:$0xff]  ;;  %v148_v13 = vld [vmem:[#allocation2 + $0xc8] sm:$0xff]  ;;  %v147_v15 = vld [vmem:[#allocation2 + $0xc0] sm:$0xff]  ;;  %s2891_s6 = scalar_lea.vmem %s2476_s27, 32  ;;  %p2896_p3 = scmp.lt.s32.totalorder %s2476_s27, %s2476_s27 }
  0x4d   :  { %170 = vmatpush1.msra.mxu0 %v151_v7  ;;  %279 = vmatpush1.msra.mxu1 %v272_v8  ;;  %v269_v14 = vld [vmem:[#allocation5 + $0xc8] sm:$0xff]  ;;  %v268_v16 = vld [vmem:[#allocation5 + $0xc0] sm:$0xff]  ;;  %v146_v17 = vld [vmem:[#allocation2 + $0xb8] sm:$0xff]  ;;  %p2892_p2 = scmp.ne.s32.totalorder %s2476_s27, %s2891_s6  ;;  %p2897_p4 = scmp.lt.s32.totalorder %s2891_s6, %s2891_s6 }
  0x4e   :  { %171 = vmatprep.subr.mxu0 %v150_v9  ;;  %280 = vmatprep.subr.mxu1 %v271_v10  ;;  %v267_v18 = vld [vmem:[#allocation5 + $0xb8] sm:$0xff]  ;;  %v145_v19 = vld [vmem:[#allocation2 + $0xb0] sm:$0xff]  ;;  %v144_v21 = vld [vmem:[#allocation2 + $0xa8] sm:$0xff] }
  0x4f   :  { %172 = vmatpush1.msra.mxu0 %v149_v11  ;;  %281 = vmatpush1.msra.mxu1 %v270_v12  ;;  %v266_v20 = vld [vmem:[#allocation5 + $0xb0] sm:$0xff]  ;;  %v265_v22 = vld [vmem:[#allocation5 + $0xa8] sm:$0xff]  ;;  %v143_v23 = vld [vmem:[#allocation2 + $0xa0] sm:$0xff]  ;;  %p2898_p5 = por %p2897_p4, %p2896_p3 }
  0x50   :  { %173 = vmatprep.subr.mxu0 %v148_v13  ;;  %282 = vmatprep.subr.mxu1 %v269_v14  ;;  %v264_v24 = vld [vmem:[#allocation5 + $0xa0] sm:$0xff]  ;;  %v142_v25 = vld [vmem:[#allocation2 + $0x98] sm:$0xff]  ;;  %v141_v27 = vld [vmem:[#allocation2 + $0x90] sm:$0xff] }
  0x51   :  { %174 = vmatpush1.msra.mxu0 %v147_v15  ;;  %283 = vmatpush1.msra.mxu1 %v268_v16  ;;  %v263_v26 = vld [vmem:[#allocation5 + $0x98] sm:$0xff]  ;;  %v262_v28 = vld [vmem:[#allocation5 + $0x90] sm:$0xff]  ;;  %v140_v29 = vld [vmem:[#allocation2 + $0x88] sm:$0xff]  ;;  %p2899_p6 = pnand %p2898_p5, %p2892_p2 }
  0x52   :  { %175 = vmatprep.subr.mxu0 %v146_v17  ;;  %284 = vmatprep.subr.mxu1 %v267_v18  ;;  %v261_v30 = vld [vmem:[#allocation5 + $0x88] sm:$0xff]  ;;  %v139_v31 = vld [vmem:[#allocation2 + $0x80] sm:$0xff]  ;;  %v138_v33 = vld [vmem:[#allocation2 + $0x78] sm:$0xff] }
  0x53   :  { %176 = vmatpush1.msra.mxu0 %v145_v19  ;;  %285 = vmatpush1.msra.mxu1 %v266_v20  ;;  %v260_v32 = vld [vmem:[#allocation5 + $0x80] sm:$0xff]  ;;  %v259_v34 = vld [vmem:[#allocation5 + $0x78] sm:$0xff]  ;;  %v137_v35 = vld [vmem:[#allocation2 + $0x70] sm:$0xff]  ;;  %v157_v20 = vlaneseq }
  0x54   :  { %177 = vmatprep.subr.mxu0 %v144_v21  ;;  %286 = vmatprep.subr.mxu1 %v265_v22  ;;  %v258_v36 = vld [vmem:[#allocation5 + $0x70] sm:$0xff]  ;;  %v136_v37 = vld [vmem:[#allocation2 + $0x68] sm:$0xff]  ;;  %v135_v39 = vld [vmem:[#allocation2 + $0x60] sm:$0xff] }
  0x55   :  { %178 = vmatpush1.msra.mxu0 %v143_v23  ;;  %287 = vmatpush1.msra.mxu1 %v264_v24  ;;  %v257_v38 = vld [vmem:[#allocation5 + $0x68] sm:$0xff]  ;;  %v256_v40 = vld [vmem:[#allocation5 + $0x60] sm:$0xff]  ;;  %v134_v41 = vld [vmem:[#allocation2 + $0x58] sm:$0xff]  ;;  %v3125_v21 = vshrl.u32 %v157_v20, 7 }
  0x56   :  { %179 = vmatprep.subr.mxu0 %v142_v25  ;;  %288 = vmatprep.subr.mxu1 %v263_v26  ;;  %v255_v42 = vld [vmem:[#allocation5 + $0x58] sm:$0xff]  ;;  %v133_v43 = vld [vmem:[#allocation2 + $0x50] sm:$0xff]  ;;  %v132_v45 = vld [vmem:[#allocation2 + $0x48] sm:$0xff] }
  0x57   :  { %180 = vmatpush1.msra.mxu0 %v141_v27  ;;  %289 = vmatpush1.msra.mxu1 %v262_v28  ;;  %v254_v44 = vld [vmem:[#allocation5 + $0x50] sm:$0xff]  ;;  %v253_v46 = vld [vmem:[#allocation5 + $0x48] sm:$0xff]  ;;  %v131_v47 = vld [vmem:[#allocation2 + $0x40] sm:$0xff]  ;;  %v159_v22 = vsub.s32 0, %v3125_v21  ;;  %v163_v27 = vsub.s32 1, %v3125_v21 }
  0x58   :  { %181 = vmatprep.subr.mxu0 %v140_v29  ;;  %290 = vmatprep.subr.mxu1 %v261_v30  ;;  %v252_v48 = vld [vmem:[#allocation5 + $0x40] sm:$0xff]  ;;  %v130_v49 = vld [vmem:[#allocation2 + $0x38] sm:$0xff]  ;;  %v129_v51 = vld [vmem:[#allocation2 + $0x30] sm:$0xff] }
  0x59   :  { %182 = vmatpush1.msra.mxu0 %v139_v31  ;;  %291 = vmatpush1.msra.mxu1 %v260_v32  ;;  %v251_v50 = vld [vmem:[#allocation5 + $0x38] sm:$0xff]  ;;  %v250_v52 = vld [vmem:[#allocation5 + $0x30] sm:$0xff]  ;;  %v128_v53 = vld [vmem:[#allocation2 + $0x28] sm:$0xff] }
  0x5a   :  { %183 = vmatprep.subr.mxu0 %v138_v33  ;;  %292 = vmatprep.subr.mxu1 %v259_v34  ;;  %v249_v54 = vld [vmem:[#allocation5 + $0x28] sm:$0xff]  ;;  %v127_v55 = vld [vmem:[#allocation2 + $0x20] sm:$0xff]  ;;  %v126_v57 = vld [vmem:[#allocation2 + $0x18] sm:$0xff] }
  0x5b   :  { %184 = vmatpush1.msra.mxu0 %v137_v35  ;;  %293 = vmatpush1.msra.mxu1 %v258_v36  ;;  %v248_v56 = vld [vmem:[#allocation5 + $0x20] sm:$0xff]  ;;  %v247_v58 = vld [vmem:[#allocation5 + $0x18] sm:$0xff]  ;;  %v125_v59 = vld [vmem:[#allocation2 + $0x10] sm:$0xff] }
  0x5c   :  { %185 = vmatprep.subr.mxu0 %v136_v37  ;;  %294 = vmatprep.subr.mxu1 %v257_v38  ;;  %v246_v60 = vld [vmem:[#allocation5 + $0x10] sm:$0xff]  ;;  %v124_v61 = vld [vmem:[#allocation2 + $0x8] sm:$0xff]  ;;  %v123_v63 = vld [vmem:[#allocation2] sm:$0xff] }
  0x5d   :  { %186 = vmatpush1.msra.mxu0 %v135_v39  ;;  %295 = vmatpush1.msra.mxu1 %v256_v40  ;;  %v245_v62 = vld [vmem:[#allocation5 + $0x8] sm:$0xff]  ;;  %v244_v1 = vld [vmem:[#allocation5] sm:$0xff]  ;;  %v3034_v3 = vld [vmem:[#allocation7 + $0x78] sm:$0xff] }
  0x5e   :  { %187 = vmatprep.subr.mxu0 %v134_v41  ;;  %296 = vmatprep.subr.mxu1 %v255_v42  ;;  %v121_v2 = vld [vmem:[%s3593_s0] sm:$0xff]  ;;  %v3036_v4 = vld [vmem:[#allocation7 + $0x70] sm:$0xff]  ;;  %v3038_v5 = vld [vmem:[#allocation7 + $0x68] sm:$0xff] }
  0x5f   :  { %188 = vmatpush1.msra.mxu0 %v133_v43  ;;  %297 = vmatpush1.msra.mxu1 %v254_v44  ;;  %v3042_v6 = vld [vmem:[#allocation7 + $0x60] sm:$0xff]  ;;  %v122_v7 = vld [vmem:[%s3593_s0 + $0x8] sm:$0xff]  ;;  %v3048_v8 = vld [vmem:[#allocation7 + $0x58] sm:$0xff] }
  0x60   :  { %189 = vmatprep.subr.mxu0 %v132_v45  ;;  %298 = vmatprep.subr.mxu1 %v253_v46  ;;  %v3052_v9 = vld [vmem:[#allocation7 + $0x50] sm:$0xff]  ;;  %v3056_v10 = vld [vmem:[#allocation7 + $0x48] sm:$0xff]  ;;  %v3059_v11 = vld [vmem:[#allocation7 + $0x40] sm:$0xff] }
  0x61   :  { %190 = vmatpush1.msra.mxu0 %v131_v47  ;;  %299 = vmatpush1.msra.mxu1 %v252_v48  ;;  %v3062_v12 = vld [vmem:[#allocation7 + $0x38] sm:$0xff]  ;;  %v3066_v13 = vld [vmem:[#allocation7 + $0x30] sm:$0xff]  ;;  %v3070_v14 = vld [vmem:[#allocation7 + $0x28] sm:$0xff] }
  0x62   :  { %191 = vmatprep.subr.mxu0 %v130_v49  ;;  %300 = vmatprep.subr.mxu1 %v251_v50  ;;  %v3074_v15 = vld [vmem:[#allocation7 + $0x20] sm:$0xff]  ;;  %v3078_v16 = vld [vmem:[#allocation7 + $0x18] sm:$0xff]  ;;  %v3082_v17 = vld [vmem:[#allocation7 + $0x10] sm:$0xff] }
  0x63   :  { %192 = vmatpush1.msra.mxu0 %v129_v51  ;;  %301 = vmatpush1.msra.mxu1 %v250_v52  ;;  %v3086_v18 = vld [vmem:[#allocation7 + $0x8] sm:$0xff]  ;;  %v3090_v19 = vld [vmem:[#allocation7] sm:$0xff] }
  0x64   :  { %193 = vmatprep.subr.mxu0 %v128_v53  ;;  %302 = vmatprep.subr.mxu1 %v249_v54  ;;  %v155_v23 = vld [vmem:[%s3596_s3] sm:$0x3]  ;;  %s2930_s3 = smov 64  }
  0x65   :  { %194 = vmatpush1.msra.mxu0 %v127_v55  ;;  %303 = vmatpush1.msra.mxu1 %v248_v56  ;;  %v160_v26 = vrot.slane %v155_v23, %v159_v22  ;;  %v164_v36 = vrot.slane %v155_v23, %v163_v27 }
  0x66   :  { %195 = vmatprep.subr.mxu0 %v126_v57  ;;  %304 = vmatprep.subr.mxu1 %v247_v58 }
  0x67   :  { %196 = vmatpush1.msra.mxu0 %v125_v59  ;;  %305 = vmatpush1.msra.mxu1 %v246_v60 }
  0x68   :  { %197 = vmatprep.subr.mxu0 %v124_v61  ;;  %306 = vmatprep.subr.mxu1 %v245_v62 }
  0x69   :  { %198 = vmatpush1.msra.mxu0 %v123_v63  ;;  %307 = vmatpush1.msra.mxu1 %v244_v1 }
  0x6a   :  { %232 = vmatmul.mubr.f32.vlgmr.msra.gmra.mxu0 %v121_v2  ;;  %341 = vmatmul.mubr.f32.vlgmr.msra.gmra.mxu1 %v121_v2 }
  0x6b   :  { %413 = vmatprep.subr.mxu0 %v3034_v3  ;;  %346 = vmatprep.mubr.f32.mxu1 %v2929_v0 }
  0x6c   :  { %414 = vmatpush1.msra.mxu0 %v3036_v4  ;;  %237 = vmatprep.mubr.f32.mxu0 %v2929_v0 }
  0x6d   :  { %415 = vmatprep.subr.mxu0 %v3038_v5  ;;  %519 = vmatprep.subr.mxu1 %v3034_v3 }
  0x6e   :  { %416 = vmatpush1.msra.mxu0 %v3042_v6  ;;  %347 = vmatmul.mubr.f32.gmra.mxu1 %v122_v7 }
  0x6f   :  { %417 = vmatprep.subr.mxu0 %v3048_v8  ;;  %238 = vmatmul.mubr.f32.gmra.mxu0 %v122_v7 }
  0x70   :  { %418 = vmatpush1.msra.mxu0 %v3052_v9  ;;  %461 = vmatprep.mubr.f32.mxu0 %v2929_v0 }
  0x71   :  { %419 = vmatprep.subr.mxu0 %v3056_v10  ;;  %520 = vmatpush1.msra.mxu1 %v3036_v4 }
  0x72   :  { %420 = vmatpush1.msra.mxu0 %v3059_v11  ;;  %521 = vmatprep.subr.mxu1 %v3038_v5 }
  0x73   :  { %421 = vmatprep.subr.mxu0 %v3062_v12  ;;  %522 = vmatpush1.msra.mxu1 %v3042_v6 }
  0x74   :  { %422 = vmatpush1.msra.mxu0 %v3066_v13  ;;  %523 = vmatprep.subr.mxu1 %v3048_v8 }
  0x75   :  { %423 = vmatprep.subr.mxu0 %v3070_v14  ;;  %524 = vmatpush1.msra.mxu1 %v3052_v9 }
  0x76   :  { %424 = vmatpush1.msra.mxu0 %v3074_v15  ;;  %525 = vmatprep.subr.mxu1 %v3056_v10 }
  0x77   :  { %425 = vmatprep.subr.mxu0 %v3078_v16  ;;  %526 = vmatpush1.msra.mxu1 %v3059_v11 }
  0x78   :  { %426 = vmatpush1.msra.mxu0 %v3082_v17  ;;  %527 = vmatprep.subr.mxu1 %v3062_v12 }
  0x79   :  { %427 = vmatprep.subr.mxu0 %v3086_v18  ;;  %528 = vmatpush1.msra.mxu1 %v3066_v13 }
  0x7a   :  { %428 = vmatpush1.msra.mxu0 %v3090_v19  ;;  %529 = vmatprep.subr.mxu1 %v3070_v14 }
  0x7b   :  { %462 = vmatmul.mubr.f32.vlgmr.msra.gmra.mxu0 %v2929_v0  ;;  %530 = vmatpush1.msra.mxu1 %v3074_v15 }
  0x7c   :  { %531 = vmatprep.subr.mxu1 %v3078_v16  ;;  %567 = vmatprep.mubr.f32.mxu1 %v2929_v0 }
  0x7d   :  { %532 = vmatpush1.msra.mxu1 %v3082_v17  ;;  %629 = vmatprep.subr.mxu0 %v3034_v3 }
  0x7e   :  { %533 = vmatprep.subr.mxu1 %v3086_v18  ;;  %630 = vmatpush1.msra.mxu0 %v3036_v4 }
  0x7f   :  { %534 = vmatpush1.msra.mxu1 %v3090_v19  ;;  %631 = vmatprep.subr.mxu0 %v3038_v5 }
  0x80   :  { %632 = vmatpush1.msra.mxu0 %v3042_v6  ;;  %677 = vmatprep.mubr.f32.mxu0 %v2929_v0 }
  0x81   :  { %633 = vmatprep.subr.mxu0 %v3048_v8  ;;  %739 = vmatprep.subr.mxu1 %v3034_v3 }
  0x82   :  { %634 = vmatpush1.msra.mxu0 %v3052_v9 }
  0x83   :  { %635 = vmatprep.subr.mxu0 %v3056_v10 }
  0x84   :  { %636 = vmatpush1.msra.mxu0 %v3059_v11 }
  0x85   :  { %637 = vmatprep.subr.mxu0 %v3062_v12 }
  0x86   :  { %638 = vmatpush1.msra.mxu0 %v3066_v13 }
  0x87   :  { %639 = vmatprep.subr.mxu0 %v3070_v14 }
  0x88   :  { %640 = vmatpush1.msra.mxu0 %v3074_v15 }
  0x89   :  { %641 = vmatprep.subr.mxu0 %v3078_v16 }
  0x8a   :  { %642 = vmatpush1.msra.mxu0 %v3082_v17 }
  0x8b   :  { %643 = vmatprep.subr.mxu0 %v3086_v18 }
  0x8c   :  { %644 = vmatpush1.msra.mxu0 %v3090_v19 }
  0x8d   :  { %857 = vmatprep.subr.mxu0 %v3034_v3 }
 0x12a   :  { %v233_v24 = vpop.f32.mrf.mxu0  ;;  %v342_v25 = vpop.f32.mrf.mxu1 }
 0x12b   :  { %v829_v30 = vrot.slane %v342_v25, 6  ;;  %v939_v31 = vrot.slane %v342_v25, 2  ;;  %v234_v33 = vadd.f32 %v233_v24, %v160_v26 }
 0x12c   :  { %v344_v28 = vpop.f32.mrf.mxu1  ;;  %v235_v29 = vpop.f32.mrf.mxu0 }
 0x12d   :  { %v830_v37 = vrot.slane %v344_v28, 6  ;;  %v940_v38 = vrot.slane %v344_v28, 2  ;;  %v236_v54 = vadd.f32 %v235_v29, %v164_v36 }
 0x12e   :  { %v348_v32 = vpop.f32.mrf.mxu1 }
 0x12f   :  { %v492_v34 = vrot.slane %v348_v32, 2  ;;  %v239_v35 = vpop.f32.mrf.mxu0  ;;  %v387_v47 = vrot.slane %v348_v32, 6 }
 0x130   :  { %v240_v39 = vadd.f32 %v239_v35, %v160_v26  ;;  %v350_v52 = vpop.f32.mrf.mxu1 }
 0x131   :  { %v3136_v40 = vadd.f32 %v492_v34, %v234_v33  ;;  %v241_v41 = vpop.f32.mrf.mxu0  ;;  %v3146_v48 = vadd.f32 %v387_v47, %v234_v33  ;;  %v388_v53 = vrot.slane %v350_v52, 6  ;;  %v493_v34 = vrot.slane %v350_v52, 2 }
 0x132   :  { %v3138_v42 = vadd.f32 %v939_v31, %v240_v39  ;;  %v242_v43 = vadd.f32 %v241_v41, %v164_v36  ;;  %v3140_v44 = vadd.f32 %v829_v30, %v240_v39 }
 0x133   :  { %v3149_v56 = vadd.f32 %v388_v53, %v236_v54  ;;  %v3176_v36 = vadd.f32 %v493_v34, %v236_v54 }
 0x134   :  { %v3142_v45 = vadd.f32 %v940_v38, %v242_v43  ;;  %v3144_v46 = vadd.f32 %v830_v37, %v242_v43 }
 0x13b   :  { %v463_v49 = vpop.f32.mrf.mxu0 }
 0x13c   :  { %v468_v50 = vadd.f32 %v463_v49, %v3146_v48 }
 0x13d   :  { %v465_v55 = vpop.f32.mrf.mxu0 }
 0x13e   :  { %v2487_v51 = vmul.f32 -1.442695, %v468_v50  ;;  %v469_v57 = vadd.f32 %v465_v55, %v3149_v56 }
 0x140   :  { %2579 = vpow2.f32 %v2487_v51  ;;  %v2488_v63 = vmul.f32 -1.442695, %v469_v57 }
 0x141   :  { %2581 = vtanh.f32 %v469_v57 }
 0x14d   :  { %v2580_v58 = vpop.eup %2579 }
 0x14e   :  { %v473_v59 = vadd.f32 1.0, %v2580_v58  ;;  %v2582_v60 = vpop.eup %2581 }
 0x150   :  { %2583 = vrcp.f32 %v473_v59 }
 0x151   :  { %2585 = vpow2.f32 %v2488_v63 }
 0x15d   :  { %v2584_v61 = vpop.eup %2583 }
 0x15e   :  { %v484_v62 = vmul.f32 %v2584_v61, %v2582_v60  ;;  %v2586_v1 = vpop.eup %2585  ;;  %v483_v7 = vmul.f32 0.0, %v2584_v61 }
 0x15f   :  { %v480_v2 = vadd.f32 1.0, %v2586_v1 }
 0x160   :  { %486 = vrot.lane.b32.xlu0 %v484_v62, %s2930_s3 }
 0x161   :  { %2587 = vrcp.f32 %v480_v2 }
 0x16e   :  { %v2588_v24 = vpop.eup %2587 }
 0x1d2   :  { %v487_v20 = vpop.permute.xlu0 %486 }
 0x1d3   :  { %v489_v23 = vadd.f32 %v487_v20, %v483_v7 }
 0x1d5   :  { %2589 = vtanh.f32 %v489_v23  ;;  %v596_v43 = vrot.slane %v489_v23, 6 }
 0x1e2   :  { %v2590_v25 = vpop.eup %2589 }
 0x1e3   :  { %v3153_v26 = vmul.f32 %v2590_v25, %v2588_v24 }
 0x1e5   :  { %499 = vrot.lane.b32.xlu0 %v3153_v26, %s2930_s3 }
 0x257   :  { %v500_v28 = vpop.permute.xlu0 %499 }
 0x258   :  { %2489 = vmatmul.mubr.msk.f32.vlgmr.msra.gmra.mxu1 %vm393_vm0, %v500_v28 }
 0x259   :  { %740 = vmatpush1.msra.mxu1 %v3036_v4  ;;  %787 = vmatprep.mubr.f32.mxu1 %v2929_v0 }
 0x25a   :  { %741 = vmatprep.subr.mxu1 %v3038_v5 }
 0x25b   :  { %742 = vmatpush1.msra.mxu1 %v3042_v6 }
 0x25c   :  { %743 = vmatprep.subr.mxu1 %v3048_v8 }
 0x25d   :  { %744 = vmatpush1.msra.mxu1 %v3052_v9 }
 0x25e   :  { %745 = vmatprep.subr.mxu1 %v3056_v10 }
 0x25f   :  { %746 = vmatpush1.msra.mxu1 %v3059_v11 }
 0x260   :  { %747 = vmatprep.subr.mxu1 %v3062_v12 }
 0x261   :  { %748 = vmatpush1.msra.mxu1 %v3066_v13 }
 0x262   :  { %749 = vmatprep.subr.mxu1 %v3070_v14 }
 0x263   :  { %750 = vmatpush1.msra.mxu1 %v3074_v15 }
 0x264   :  { %751 = vmatprep.subr.mxu1 %v3078_v16 }
 0x265   :  { %752 = vmatpush1.msra.mxu1 %v3082_v17 }
 0x266   :  { %753 = vmatprep.subr.mxu1 %v3086_v18 }
 0x267   :  { %754 = vmatpush1.msra.mxu1 %v3090_v19 }
 0x268   :  { %966 = vmatprep.subr.mxu1 %v3034_v3 }
 0x318   :  { %v569_v29 = vpop.f32.mrf.mxu1 }
 0x319   :  { %v576_v30 = vrot.slane %v569_v29, 6 }
 0x31a   :  { %v571_v33 = vpop.f32.mrf.mxu1 }
 0x31b   :  { %v580_v31 = vadd.f32 %v576_v30, %v3136_v40  ;;  %v577_v35 = vrot.slane %v571_v33, 6 }
 0x31d   :  { %v2490_v32 = vmul.f32 -1.442695, %v580_v31  ;;  %v581_v37 = vadd.f32 %v577_v35, %v3176_v36 }
 0x31f   :  { %2591 = vpow2.f32 %v2490_v32  ;;  %v2491_v51 = vmul.f32 -1.442695, %v581_v37 }
 0x320   :  { %2593 = vtanh.f32 %v581_v37 }
 0x32c   :  { %v2592_v38 = vpop.eup %2591 }
 0x32d   :  { %v585_v39 = vadd.f32 1.0, %v2592_v38  ;;  %v2594_v41 = vpop.eup %2593 }
 0x32f   :  { %2595 = vrcp.f32 %v585_v39 }
 0x330   :  { %2597 = vpow2.f32 %v2491_v51 }
 0x33c   :  { %v2596_v47 = vpop.eup %2595 }
 0x33d   :  { %v599_v49 = vmul.f32 %v2596_v47, %v2594_v41  ;;  %v598_v50 = vmul.f32 %v2596_v47, %v596_v43  ;;  %v2598_v53 = vpop.eup %2597 }
 0x33e   :  { %v592_v52 = vadd.f32 1.0, %v2598_v53 }
 0x33f   :  { %601 = vrot.lane.b32.xlu1 %v599_v49, %s2930_s3 }
 0x340   :  { %2599 = vrcp.f32 %v592_v52 }
 0x34d   :  { %v2600_v57 = vpop.eup %2599 }
 0x3b1   :  { %v602_v55 = vpop.permute.xlu1 %601 }
 0x3b2   :  { %v604_v54 = vadd.f32 %v602_v55, %v598_v50 }
 0x3b4   :  { %2601 = vtanh.f32 %v604_v54  ;;  %v706_v29 = vrot.slane %v604_v54, 6 }
 0x3c1   :  { %v2602_v58 = vpop.eup %2601 }
 0x3c2   :  { %v606_v59 = vmul.f32 %v2602_v58, %v2600_v57 }
 0x3c4   :  { %v608_v60 = vrot.slane %v606_v59, 2  ;;  %v1275_v41 = vsel %vm1274_vm1, %v3153_v26, %v606_v59 }
 0x3c6   :  { %609 = vrot.lane.b32.xlu1 %v608_v60, %s2930_s3 }
 0x438   :  { %v610_v61 = vpop.permute.xlu1 %609 }
 0x439   :  { %2492 = vmatmul.mubr.msk.f32.vlgmr.msra.gmra.mxu0 %vm393_vm0, %v610_v61 }
 0x43a   :  { %858 = vmatpush1.msra.mxu0 %v3036_v4  ;;  %905 = vmatprep.mubr.f32.mxu0 %v2929_v0 }
 0x43b   :  { %859 = vmatprep.subr.mxu0 %v3038_v5 }
 0x43c   :  { %860 = vmatpush1.msra.mxu0 %v3042_v6 }
 0x43d   :  { %861 = vmatprep.subr.mxu0 %v3048_v8 }
 0x43e   :  { %862 = vmatpush1.msra.mxu0 %v3052_v9 }
 0x43f   :  { %863 = vmatprep.subr.mxu0 %v3056_v10 }
 0x440   :  { %864 = vmatpush1.msra.mxu0 %v3059_v11 }
 0x441   :  { %865 = vmatprep.subr.mxu0 %v3062_v12 }
 0x442   :  { %866 = vmatpush1.msra.mxu0 %v3066_v13 }
 0x443   :  { %867 = vmatprep.subr.mxu0 %v3070_v14 }
 0x444   :  { %868 = vmatpush1.msra.mxu0 %v3074_v15 }
 0x445   :  { %869 = vmatprep.subr.mxu0 %v3078_v16 }
 0x446   :  { %870 = vmatpush1.msra.mxu0 %v3082_v17 }
 0x447   :  { %871 = vmatprep.subr.mxu0 %v3086_v18 }
 0x448   :  { %872 = vmatpush1.msra.mxu0 %v3090_v19 }
 0x449   :  { %1076 = vmatprep.subr.mxu0 %v3034_v3 }
 0x4f9   :  { %v679_v62 = vpop.f32.mrf.mxu0 }
 0x4fa   :  { %v686_v63 = vrot.slane %v679_v62, 4 }
 0x4fb   :  { %v681_v7 = vpop.f32.mrf.mxu0 }
 0x4fc   :  { %v690_v1 = vadd.f32 %v686_v63, %v3146_v48  ;;  %v687_v20 = vrot.slane %v681_v7, 4 }
 0x4fe   :  { %v2493_v2 = vmul.f32 -1.442695, %v690_v1  ;;  %v691_v23 = vadd.f32 %v687_v20, %v3149_v56 }
 0x500   :  { %2603 = vpow2.f32 %v2493_v2  ;;  %v2494_v33 = vmul.f32 -1.442695, %v691_v23 }
 0x501   :  { %2605 = vtanh.f32 %v691_v23 }
 0x50d   :  { %v2604_v24 = vpop.eup %2603 }
 0x50e   :  { %v695_v25 = vadd.f32 1.0, %v2604_v24  ;;  %v2606_v28 = vpop.eup %2605 }
 0x510   :  { %2607 = vrcp.f32 %v695_v25 }
 0x511   :  { %2609 = vpow2.f32 %v2494_v33 }
 0x51d   :  { %v2608_v30 = vpop.eup %2607 }
 0x51e   :  { %v709_v31 = vmul.f32 %v2608_v30, %v2606_v28  ;;  %v708_v32 = vmul.f32 %v2608_v30, %v706_v29  ;;  %v2610_v48 = vpop.eup %2609 }
 0x51f   :  { %v702_v34 = vadd.f32 1.0, %v2610_v48 }
 0x520   :  { %711 = vrot.lane.b32.xlu0 %v709_v31, %s2930_s3 }
 0x521   :  { %2611 = vrcp.f32 %v702_v34 }
 0x52e   :  { %v2612_v56 = vpop.eup %2611 }
 0x592   :  { %v712_v35 = vpop.permute.xlu0 %711 }
 0x593   :  { %v714_v37 = vadd.f32 %v712_v35, %v708_v32 }
 0x595   :  { %2613 = vtanh.f32 %v714_v37  ;;  %v816_v60 = vrot.slane %v714_v37, 6 }
 0x5a2   :  { %v2614_v38 = vpop.eup %2613 }
 0x5a3   :  { %v716_v39 = vmul.f32 %v2614_v38, %v2612_v56 }
 0x5a5   :  { %v718_v43 = vrot.slane %v716_v39, 4  ;;  %v1277_v47 = vsel %vm1276_vm2, %v1275_v41, %v716_v39 }
 0x5a7   :  { %719 = vrot.lane.b32.xlu1 %v718_v43, %s2930_s3 }
 0x619   :  { %v720_v49 = vpop.permute.xlu1 %719 }
 0x61a   :  { %2495 = vmatmul.mubr.msk.f32.vlgmr.msra.gmra.mxu1 %vm393_vm0, %v720_v49 }
 0x61b   :  { %967 = vmatpush1.msra.mxu1 %v3036_v4  ;;  %1014 = vmatprep.mubr.f32.mxu1 %v2929_v0 }
 0x61c   :  { %968 = vmatprep.subr.mxu1 %v3038_v5 }
 0x61d   :  { %969 = vmatpush1.msra.mxu1 %v3042_v6 }
 0x61e   :  { %970 = vmatprep.subr.mxu1 %v3048_v8 }
 0x61f   :  { %971 = vmatpush1.msra.mxu1 %v3052_v9 }
 0x620   :  { %972 = vmatprep.subr.mxu1 %v3056_v10 }
 0x621   :  { %973 = vmatpush1.msra.mxu1 %v3059_v11 }
 0x622   :  { %974 = vmatprep.subr.mxu1 %v3062_v12 }
 0x623   :  { %975 = vmatpush1.msra.mxu1 %v3066_v13 }
 0x624   :  { %976 = vmatprep.subr.mxu1 %v3070_v14 }
 0x625   :  { %977 = vmatpush1.msra.mxu1 %v3074_v15 }
 0x626   :  { %978 = vmatprep.subr.mxu1 %v3078_v16 }
 0x627   :  { %979 = vmatpush1.msra.mxu1 %v3082_v17 }
 0x628   :  { %980 = vmatprep.subr.mxu1 %v3086_v18 }
 0x629   :  { %981 = vmatpush1.msra.mxu1 %v3090_v19 }
 0x62a   :  { %1186 = vmatprep.subr.mxu1 %v3034_v3 }
 0x6da   :  { %v789_v26 = vpop.f32.mrf.mxu1 }
 0x6db   :  { %v796_v50 = vrot.slane %v789_v26, 2 }
 0x6dc   :  { %v791_v52 = vpop.f32.mrf.mxu1 }
 0x6dd   :  { %v800_v51 = vadd.f32 %v796_v50, %v3136_v40  ;;  %v797_v55 = vrot.slane %v791_v52, 2 }
 0x6df   :  { %v2496_v53 = vmul.f32 -1.442695, %v800_v51  ;;  %v801_v54 = vadd.f32 %v797_v55, %v3176_v36 }
 0x6e1   :  { %2615 = vpow2.f32 %v2496_v53  ;;  %v2497_v3 = vmul.f32 -1.442695, %v801_v54 }
 0x6e2   :  { %2617 = vtanh.f32 %v801_v54 }
 0x6ee   :  { %v2616_v57 = vpop.eup %2615 }
 0x6ef   :  { %v805_v58 = vadd.f32 1.0, %v2616_v57  ;;  %v2618_v59 = vpop.eup %2617 }
 0x6f1   :  { %2619 = vrcp.f32 %v805_v58 }
 0x6f2   :  { %2621 = vpow2.f32 %v2497_v3 }
 0x6fe   :  { %v2620_v61 = vpop.eup %2619 }
 0x6ff   :  { %v819_v62 = vmul.f32 %v2620_v61, %v2618_v59  ;;  %v818_v63 = vmul.f32 %v2620_v61, %v816_v60  ;;  %v2622_v40 = vpop.eup %2621 }
 0x700   :  { %v812_v1 = vadd.f32 1.0, %v2622_v40 }
 0x701   :  { %821 = vrot.lane.b32.xlu0 %v819_v62, %s2930_s3 }
 0x702   :  { %2623 = vrcp.f32 %v812_v1 }
 0x70f   :  { %v2624_v36 = vpop.eup %2623 }
 0x773   :  { %v822_v2 = vpop.permute.xlu0 %821 }
 0x774   :  { %v824_v7 = vadd.f32 %v822_v2, %v818_v63 }
 0x776   :  { %2625 = vtanh.f32 %v824_v7  ;;  %v928_v37 = vrot.slane %v824_v7, 6 }
 0x783   :  { %v2626_v20 = vpop.eup %2625 }
 0x784   :  { %v826_v23 = vmul.f32 %v2626_v20, %v2624_v36 }
 0x786   :  { %v836_v24 = vrot.slane %v826_v23, 6  ;;  %v3228_v25 = vsel %vm1278_vm3, %v1277_v47, %v826_v23 }
 0x788   :  { %837 = vrot.lane.b32.xlu1 %v836_v24, %s2930_s3 }
 0x7fa   :  { %v838_v28 = vpop.permute.xlu1 %837 }
 0x7fb   :  { %2498 = vmatmul.mubr.msk.f32.vlgmr.msra.gmra.mxu0 %vm393_vm0, %v838_v28 }
 0x7fc   :  { %1077 = vmatpush1.msra.mxu0 %v3036_v4  ;;  %1124 = vmatprep.mubr.f32.mxu0 %v2929_v0 }
 0x7fd   :  { %1078 = vmatprep.subr.mxu0 %v3038_v5 }
 0x7fe   :  { %1079 = vmatpush1.msra.mxu0 %v3042_v6 }
 0x7ff   :  { %1080 = vmatprep.subr.mxu0 %v3048_v8 }
 0x800   :  { %1081 = vmatpush1.msra.mxu0 %v3052_v9 }
 0x801   :  { %1082 = vmatprep.subr.mxu0 %v3056_v10 }
 0x802   :  { %1083 = vmatpush1.msra.mxu0 %v3059_v11 }
 0x803   :  { %1084 = vmatprep.subr.mxu0 %v3062_v12 }
 0x804   :  { %1085 = vmatpush1.msra.mxu0 %v3066_v13 }
 0x805   :  { %1086 = vmatprep.subr.mxu0 %v3070_v14 }
 0x806   :  { %1087 = vmatpush1.msra.mxu0 %v3074_v15 }
 0x807   :  { %1088 = vmatprep.subr.mxu0 %v3078_v16 }
 0x808   :  { %1089 = vmatpush1.msra.mxu0 %v3082_v17 }
 0x809   :  { %1090 = vmatprep.subr.mxu0 %v3086_v18 }
 0x80a   :  { %1091 = vmatpush1.msra.mxu0 %v3090_v19 }
 0x8bb   :  { %v907_v29 = vpop.f32.mrf.mxu0 }
 0x8bc   :  { %v912_v30 = vadd.f32 %v907_v29, %v3140_v44 }
 0x8bd   :  { %v909_v32 = vpop.f32.mrf.mxu0 }
 0x8be   :  { %v2499_v31 = vmul.f32 -1.442695, %v912_v30  ;;  %v913_v33 = vadd.f32 %v909_v32, %v3144_v46 }
 0x8c0   :  { %2627 = vpow2.f32 %v2499_v31  ;;  %v2500_v41 = vmul.f32 -1.442695, %v913_v33 }
 0x8c1   :  { %2629 = vtanh.f32 %v913_v33  ;;  %v1298_v33 = vld [vmem:[#allocation8 + $0x78] sm:$0xff] }
 0x8c2   :  { %1337 = vmatprep.subr.mxu0 %v1298_v33 }
 0x8cd   :  { %v2628_v48 = vpop.eup %2627 }
 0x8ce   :  { %v917_v34 = vadd.f32 1.0, %v2628_v48  ;;  %v2630_v35 = vpop.eup %2629  ;;  %v1297_v48 = vld [vmem:[#allocation8 + $0x70] sm:$0xff] }
 0x8d0   :  { %2631 = vrcp.f32 %v917_v34  ;;  %v1295_v34 = vld [vmem:[#allocation8 + $0x60] sm:$0xff] }
 0x8d1   :  { %2633 = vpow2.f32 %v2500_v41  ;;  %v1289_v41 = vld [vmem:[#allocation8 + $0x30] sm:$0xff] }
 0x8dd   :  { %v2632_v56 = vpop.eup %2631 }
 0x8de   :  { %v931_v38 = vmul.f32 %v2632_v56, %v2630_v35  ;;  %v930_v39 = vmul.f32 %v2632_v56, %v928_v37  ;;  %v2634_v43 = vpop.eup %2633  ;;  %v1294_v35 = vld [vmem:[#allocation8 + $0x58] sm:$0xff]  ;;  %v1292_v37 = vld [vmem:[#allocation8 + $0x48] sm:$0xff] }
 0x8df   :  { %v924_v47 = vadd.f32 1.0, %v2634_v43  ;;  %v1413_v56 = vld [vmem:[#allocation10 + $0x78] sm:$0xff]  ;;  %v1288_v43 = vld [vmem:[#allocation8 + $0x28] sm:$0xff] }
 0x8e0   :  { %933 = vrot.lane.b32.xlu0 %v931_v38, %s2930_s3  ;;  %v1291_v38 = vld [vmem:[#allocation8 + $0x40] sm:$0xff] }
 0x8e1   :  { %2635 = vrcp.f32 %v924_v47  ;;  %v1287_v47 = vld [vmem:[#allocation8 + $0x20] sm:$0xff] }
 0x8ee   :  { %v2636_v50 = vpop.eup %2635 }
 0x952   :  { %v934_v49 = vpop.permute.xlu0 %933 }
 0x953   :  { %v936_v26 = vadd.f32 %v934_v49, %v930_v39  ;;  %v1290_v39 = vld [vmem:[#allocation8 + $0x38] sm:$0xff] }
 0x955   :  { %2637 = vtanh.f32 %v936_v26 }
 0x962   :  { %v2638_v51 = vpop.eup %2637 }
 0x963   :  { %v3251_v53 = vmul.f32 %v2638_v51, %v2636_v50 }
 0x965   :  { %946 = vrot.lane.b32.xlu1 %v3251_v53, %s2930_s3 }
 0x9d7   :  { %v947_v52 = vpop.permute.xlu1 %946 }
 0x9d8   :  { %2501 = vmatmul.mubr.msk.f32.vlgmr.msra.gmra.mxu1 %vm393_vm0, %v947_v52 }
 0x9d9   :  { %1187 = vmatpush1.msra.mxu1 %v3036_v4  ;;  %1234 = vmatprep.mubr.f32.mxu1 %v2929_v0 }
 0x9da   :  { %1188 = vmatprep.subr.mxu1 %v3038_v5 }
 0x9db   :  { %1189 = vmatpush1.msra.mxu1 %v3042_v6 }
 0x9dc   :  { %1190 = vmatprep.subr.mxu1 %v3048_v8 }
 0x9dd   :  { %1191 = vmatpush1.msra.mxu1 %v3052_v9 }
 0x9de   :  { %1192 = vmatprep.subr.mxu1 %v3056_v10 }
 0x9df   :  { %1193 = vmatpush1.msra.mxu1 %v3059_v11 }
 0x9e0   :  { %1194 = vmatprep.subr.mxu1 %v3062_v12 }
 0x9e1   :  { %1195 = vmatpush1.msra.mxu1 %v3066_v13 }
 0x9e2   :  { %1196 = vmatprep.subr.mxu1 %v3070_v14 }
 0x9e3   :  { %1197 = vmatpush1.msra.mxu1 %v3074_v15  ;;  %v1043_v15 = vrot.slane %v936_v26, 6 }
 0x9e4   :  { %1198 = vmatprep.subr.mxu1 %v3078_v16 }
 0x9e5   :  { %1199 = vmatpush1.msra.mxu1 %v3082_v17 }
 0x9e6   :  { %1200 = vmatprep.subr.mxu1 %v3086_v18 }
 0x9e7   :  { %1201 = vmatpush1.msra.mxu1 %v3090_v19 }
 0x9e8   :  { %1430 = vmatprep.subr.mxu1 %v1413_v56  ;;  %v3333_v56 = vld [vmem:[#allocation11 + $0x38] sm:$0xff] }
 0xa98   :  { %v1016_v4 = vpop.f32.mrf.mxu1 }
 0xa99   :  { %v1023_v5 = vrot.slane %v1016_v4, 6  ;;  %v1286_v4 = vld [vmem:[#allocation8 + $0x18] sm:$0xff] }
 0xa9a   :  { %v1018_v9 = vpop.f32.mrf.mxu1 }
 0xa9b   :  { %v1027_v6 = vadd.f32 %v1023_v5, %v3138_v42  ;;  %v1024_v10 = vrot.slane %v1018_v9, 6  ;;  %v1285_v5 = vld [vmem:[#allocation8 + $0x10] sm:$0xff] }
 0xa9d   :  { %v2502_v8 = vmul.f32 -1.442695, %v1027_v6  ;;  %v1028_v11 = vadd.f32 %v1024_v10, %v3142_v45  ;;  %v1284_v6 = vld [vmem:[#allocation8 + $0x8] sm:$0xff] }
 0xa9f   :  { %2639 = vpow2.f32 %v2502_v8  ;;  %v2503_v19 = vmul.f32 -1.442695, %v1028_v11  ;;  %v1283_v8 = vld [vmem:[#allocation8] sm:$0xff] }
 0xaa0   :  { %2641 = vtanh.f32 %v1028_v11 }
 0xaac   :  { %v2640_v12 = vpop.eup %2639 }
 0xaad   :  { %v1032_v13 = vadd.f32 1.0, %v2640_v12  ;;  %v2642_v14 = vpop.eup %2641 }
 0xaaf   :  { %2643 = vrcp.f32 %v1032_v13 }
 0xab0   :  { %2645 = vpow2.f32 %v2503_v19  ;;  %v1409_v19 = vld [vmem:[#allocation10 + $0x58] sm:$0xff] }
 0xabc   :  { %v2644_v16 = vpop.eup %2643 }
 0xabd   :  { %v1046_v17 = vmul.f32 %v2644_v16, %v2642_v14  ;;  %v1045_v18 = vmul.f32 %v2644_v16, %v1043_v15  ;;  %v2646_v55 = vpop.eup %2645  ;;  %v1412_v15 = vld [vmem:[#allocation10 + $0x70] sm:$0xff] }
 0xabe   :  { %v1039_v54 = vadd.f32 1.0, %v2646_v55 }
 0xabf   :  { %1048 = vrot.lane.b32.xlu0 %v1046_v17, %s2930_s3  ;;  %v1411_v17 = vld [vmem:[#allocation10 + $0x68] sm:$0xff] }
 0xac0   :  { %2647 = vrcp.f32 %v1039_v54  ;;  %v1407_v54 = vld [vmem:[#allocation10 + $0x48] sm:$0xff] }
 0xacd   :  { %v2648_v59 = vpop.eup %2647 }
 0xb31   :  { %v1049_v57 = vpop.permute.xlu0 %1048 }
 0xb32   :  { %v1051_v58 = vadd.f32 %v1049_v57, %v1045_v18  ;;  %v1410_v18 = vld [vmem:[#allocation10 + $0x60] sm:$0xff] }
 0xb33   :  { %v1406_v57 = vld [vmem:[#allocation10 + $0x40] sm:$0xff] }
 0xb34   :  { %2649 = vtanh.f32 %v1051_v58  ;;  %v1153_v29 = vrot.slane %v1051_v58, 6  ;;  %v1404_v58 = vld [vmem:[#allocation10 + $0x30] sm:$0xff] }
 0xb41   :  { %v2650_v60 = vpop.eup %2649 }
 0xb42   :  { %v3275_v61 = vmul.f32 %v2650_v60, %v2648_v59  ;;  %v1403_v59 = vld [vmem:[#allocation10 + $0x28] sm:$0xff]  ;;  %v1402_v60 = vld [vmem:[#allocation10 + $0x20] sm:$0xff] }
 0xb44   :  { %v1055_v62 = vrot.slane %v3275_v61, 2  ;;  %v1280_v12 = vsel %vm1274_vm1, %v3251_v53, %v3275_v61  ;;  %v1408_v53 = vld [vmem:[#allocation10 + $0x50] sm:$0xff]  ;;  %v1401_v61 = vld [vmem:[#allocation10 + $0x18] sm:$0xff] }
 0xb46   :  { %1056 = vrot.lane.b32.xlu1 %v1055_v62, %s2930_s3  ;;  %v1400_v62 = vld [vmem:[#allocation10 + $0x10] sm:$0xff] }
 0xbb8   :  { %v1057_v63 = vpop.permute.xlu1 %1056 }
 0xbb9   :  { %2504 = vmatmul.mubr.msk.f32.vlgmr.msra.gmra.mxu0 %vm393_vm0, %v1057_v63  ;;  %v1399_v63 = vld [vmem:[#allocation10 + $0x8] sm:$0xff] }
 0xbba   :  { %1385 = vmatprep.mubr.f32.mxu0 %v2929_v0  ;;  %1338 = vmatpush1.msra.mxu0 %v1297_v48  ;;  %v3306_v48 = vld [vmem:[#allocation11 + $0x78] sm:$0xff] }
 0xc79   :  { %v1126_v3 = vpop.f32.mrf.mxu0 }
 0xc7a   :  { %v1133_v40 = vrot.slane %v1126_v3, 4  ;;  %v1398_v3 = vld [vmem:[#allocation10] sm:$0xff] }
 0xc7b   :  { %v1128_v7 = vpop.f32.mrf.mxu0 }
 0xc7c   :  { %v1137_v1 = vadd.f32 %v1133_v40, %v3140_v44  ;;  %v1134_v36 = vrot.slane %v1128_v7, 4  ;;  %v1296_v44 = vld [vmem:[#allocation8 + $0x68] sm:$0xff] }
 0xc7d   :  { %1339 = vmatprep.subr.mxu0 %v1296_v44  ;;  %v3310_v44 = vld [vmem:[#allocation11 + $0x68] sm:$0xff] }
 0xc7e   :  { %v2505_v2 = vmul.f32 -1.442695, %v1137_v1  ;;  %v1138_v20 = vadd.f32 %v1134_v36, %v3144_v46  ;;  %v1293_v46 = vld [vmem:[#allocation8 + $0x50] sm:$0xff]  ;;  %1340 = vmatpush1.msra.mxu0 %v1295_v34  ;;  %v3317_v34 = vld [vmem:[#allocation11 + $0x58] sm:$0xff] }
 0xc7f   :  { %1341 = vmatprep.subr.mxu0 %v1294_v35  ;;  %v3321_v35 = vld [vmem:[#allocation11 + $0x50] sm:$0xff] }
 0xc80   :  { %2651 = vpow2.f32 %v2505_v2  ;;  %1342 = vmatpush1.msra.mxu0 %v1293_v46  ;;  %v2506_v49 = vmul.f32 -1.442695, %v1138_v20  ;;  %v3325_v46 = vld [vmem:[#allocation11 + $0x48] sm:$0xff] }
 0xc81   :  { %2653 = vtanh.f32 %v1138_v20  ;;  %1343 = vmatprep.subr.mxu0 %v1292_v37  ;;  %v3329_v37 = vld [vmem:[#allocation11 + $0x40] sm:$0xff] }
 0xc82   :  { %1344 = vmatpush1.msra.mxu0 %v1291_v38  ;;  %v3337_v38 = vld [vmem:[#allocation11 + $0x30] sm:$0xff] }
 0xc83   :  { %1345 = vmatprep.subr.mxu0 %v1290_v39  ;;  %v3341_v39 = vld [vmem:[#allocation11 + $0x28] sm:$0xff] }
 0xc84   :  { %1346 = vmatpush1.msra.mxu0 %v1289_v41 }
 0xc85   :  { %1347 = vmatprep.subr.mxu0 %v1288_v43 }
 0xc86   :  { %1348 = vmatpush1.msra.mxu0 %v1287_v47 }
 0xc87   :  { %1349 = vmatprep.subr.mxu0 %v1286_v4  ;;  %v3357_v4 = vld [vmem:[#allocation11 + $0x8] sm:$0xff] }
 0xc88   :  { %1350 = vmatpush1.msra.mxu0 %v1285_v5  ;;  %v3361_v5 = vld [vmem:[#allocation11] sm:$0xff] }
 0xc89   :  { %1351 = vmatprep.subr.mxu0 %v1284_v6 }
 0xc8a   :  { %1352 = vmatpush1.msra.mxu0 %v1283_v8 }
 0xc8b   :  { %1515 = vmatprep.subr.mxu0 %v3306_v48 }
 0xc8d   :  { %v2652_v23 = vpop.eup %2651 }
 0xc8e   :  { %v1142_v24 = vadd.f32 1.0, %v2652_v23  ;;  %v2654_v28 = vpop.eup %2653 }
 0xc90   :  { %2655 = vrcp.f32 %v1142_v24 }
 0xc91   :  { %2657 = vpow2.f32 %v2506_v49 }
 0xc9d   :  { %v2656_v30 = vpop.eup %2655 }
 0xc9e   :  { %v1156_v31 = vmul.f32 %v2656_v30, %v2654_v28  ;;  %v1155_v32 = vmul.f32 %v2656_v30, %v1153_v29  ;;  %v2658_v26 = vpop.eup %2657 }
 0xc9f   :  { %v1149_v50 = vadd.f32 1.0, %v2658_v26 }
 0xca0   :  { %1158 = vrot.lane.b32.xlu0 %v1156_v31, %s2930_s3 }
 0xca1   :  { %2659 = vrcp.f32 %v1149_v50  ;;  %v3350_v50 = vld [vmem:[#allocation11 + $0x20] sm:$0xff] }
 0xcae   :  { %v2660_v9 = vpop.eup %2659 }
 0xd12   :  { %v1159_v51 = vpop.permute.xlu0 %1158 }
 0xd13   :  { %v3284_v52 = vadd.f32 %v1159_v51, %v1155_v32  ;;  %v3353_v51 = vld [vmem:[#allocation11 + $0x18] sm:$0xff] }
 0xd15   :  { %2661 = vtanh.f32 %v3284_v52  ;;  %v1263_v30 = vrot.slane %v3284_v52, 6  ;;  %v3355_v52 = vld [vmem:[#allocation11 + $0x10] sm:$0xff] }
 0xd22   :  { %v2662_v10 = vpop.eup %2661 }
 0xd23   :  { %v1163_v11 = vmul.f32 %v2662_v10, %v2660_v9 }
 0xd25   :  { %v1165_v13 = vrot.slane %v1163_v11, 4  ;;  %v3291_v14 = vsel %vm1276_vm2, %v1280_v12, %v1163_v11  ;;  %v1299_v12 = vld [vmem:[%s3600_s7] sm:$0x3] }
 0xd27   :  { %1166 = vrot.lane.b32.xlu1 %v1165_v13, %s2930_s3 }
 0xd2b   :  { %1313 = vrot.lane.b32.xlu1 %v3228_v25, %s2930_s3  ;;  %v1405_v25 = vld [vmem:[#allocation10 + $0x38] sm:$0xff] }
 0xd99   :  { %v1167_v16 = vpop.permute.xlu1 %1166 }
 0xd9a   :  { %2507 = vmatmul.mubr.msk.f32.vlgmr.msra.gmra.mxu1 %vm393_vm0, %v1167_v16 }
 0xd9b   :  { %1431 = vmatpush1.msra.mxu1 %v1412_v15  ;;  %1478 = vmatprep.mubr.f32.mxu1 %v2929_v0  ;;  %v1304_v15 = vrot.slane %v1299_v12, %v159_v22 }
 0xd9c   :  { %1432 = vmatprep.subr.mxu1 %v1411_v17 }
 0xd9d   :  { %1433 = vmatpush1.msra.mxu1 %v1410_v18  ;;  %v1314_v55 = vpop.permute.xlu1 %1313 }
 0xd9e   :  { %1434 = vmatprep.subr.mxu1 %v1409_v19  ;;  %2510 = vmatmul.mubr.msk.f32.vlgmr.msra.gmra.mxu0 %vm393_vm0, %v1314_v55 }
 0xd9f   :  { %1435 = vmatpush1.msra.mxu1 %v1408_v53  ;;  %1391 = vmatprep.mubr.f32.mxu0 %v2929_v0 }
 0xda0   :  { %1436 = vmatprep.subr.mxu1 %v1407_v54 }
 0xda1   :  { %1437 = vmatpush1.msra.mxu1 %v1406_v57 }
 0xda2   :  { %1438 = vmatprep.subr.mxu1 %v1405_v25 }
 0xda3   :  { %1439 = vmatpush1.msra.mxu1 %v1404_v58 }
 0xda4   :  { %1440 = vmatprep.subr.mxu1 %v1403_v59 }
 0xda5   :  { %1441 = vmatpush1.msra.mxu1 %v1402_v60 }
 0xda6   :  { %1442 = vmatprep.subr.mxu1 %v1401_v61 }
 0xda7   :  { %1443 = vmatpush1.msra.mxu1 %v1400_v62 }
 0xda8   :  { %1444 = vmatprep.subr.mxu1 %v1399_v63 }
 0xda9   :  { %1445 = vmatpush1.msra.mxu1 %v1398_v3 }
 0xdaa   :  { %2512 = vmatmul.mubr.msk.f32.vlgmr.msra.gmra.mxu1 %vm393_vm0, %v1314_v55  ;;  %1621 = vmatprep.subr.mxu1 %v3306_v48 }
 0xdab   :  { %1484 = vmatprep.mubr.f32.mxu1 %v2929_v0 }
 0xe5a   :  { %v1236_v40 = vpop.f32.mrf.mxu1 }
 0xe5b   :  { %v1243_v1 = vrot.slane %v1236_v40, 2 }
 0xe5c   :  { %v1238_v36 = vpop.f32.mrf.mxu1 }
 0xe5d   :  { %v1247_v2 = vadd.f32 %v1243_v1, %v3138_v42  ;;  %v1244_v20 = vrot.slane %v1238_v36, 2  ;;  %v3308_v42 = vld [vmem:[#allocation11 + $0x70] sm:$0xff] }
 0xe5e   :  { %1516 = vmatpush1.msra.mxu0 %v3308_v42  ;;  %1622 = vmatpush1.msra.mxu1 %v3308_v42  ;;  %v1387_v13 = vpop.f32.mrf.mxu0 }
 0xe5f   :  { %v2508_v7 = vmul.f32 -1.442695, %v1247_v2  ;;  %v1248_v23 = vadd.f32 %v1244_v20, %v3142_v45  ;;  %v3313_v45 = vld [vmem:[#allocation11 + $0x60] sm:$0xff]  ;;  %1517 = vmatprep.subr.mxu0 %v3310_v44  ;;  %1623 = vmatprep.subr.mxu1 %v3310_v44  ;;  %v1388_v18 = vadd.f32 %v1387_v13, %v1304_v15  ;;  %v3417_v2 = vrot.slane %v1299_v12, %v163_v27 }
 0xe60   :  { %1518 = vmatpush1.msra.mxu0 %v3313_v45  ;;  %1624 = vmatpush1.msra.mxu1 %v3313_v45  ;;  %v1389_v16 = vpop.f32.mrf.mxu0 }
 0xe61   :  { %2663 = vpow2.f32 %v2508_v7  ;;  %1519 = vmatprep.subr.mxu0 %v3317_v34  ;;  %1625 = vmatprep.subr.mxu1 %v3317_v34  ;;  %v2509_v41 = vmul.f32 -1.442695, %v1248_v23  ;;  %v1390_v36 = vadd.f32 %v1389_v16, %v3417_v2 }
 0xe62   :  { %2665 = vtanh.f32 %v1248_v23  ;;  %1520 = vmatpush1.msra.mxu0 %v3321_v35  ;;  %1626 = vmatpush1.msra.mxu1 %v3321_v35 }
 0xe63   :  { %1521 = vmatprep.subr.mxu0 %v3325_v46  ;;  %1627 = vmatprep.subr.mxu1 %v3325_v46 }
 0xe64   :  { %1522 = vmatpush1.msra.mxu0 %v3329_v37  ;;  %1628 = vmatpush1.msra.mxu1 %v3329_v37 }
 0xe65   :  { %1523 = vmatprep.subr.mxu0 %v3333_v56  ;;  %1629 = vmatprep.subr.mxu1 %v3333_v56 }
 0xe66   :  { %1524 = vmatpush1.msra.mxu0 %v3337_v38  ;;  %1630 = vmatpush1.msra.mxu1 %v3337_v38 }
 0xe67   :  { %1525 = vmatprep.subr.mxu0 %v3341_v39  ;;  %1631 = vmatprep.subr.mxu1 %v3341_v39 }
 0xe68   :  { %1526 = vmatpush1.msra.mxu0 %v3350_v50  ;;  %1632 = vmatpush1.msra.mxu1 %v3350_v50 }
 0xe69   :  { %1527 = vmatprep.subr.mxu0 %v3353_v51  ;;  %1633 = vmatprep.subr.mxu1 %v3353_v51 }
 0xe6a   :  { %1528 = vmatpush1.msra.mxu0 %v3355_v52  ;;  %1634 = vmatpush1.msra.mxu1 %v3355_v52 }
 0xe6b   :  { %1529 = vmatprep.subr.mxu0 %v3357_v4  ;;  %1635 = vmatprep.subr.mxu1 %v3357_v4 }
 0xe6c   :  { %1530 = vmatpush1.msra.mxu0 %v3361_v5  ;;  %1636 = vmatpush1.msra.mxu1 %v3361_v5 }
 0xe6d   :  { %1731 = vmatprep.subr.mxu0 %v3306_v48  ;;  %1841 = vmatprep.subr.mxu1 %v3306_v48 }
 0xe6e   :  { %v2664_v24 = vpop.eup %2663 }
 0xe6f   :  { %v1252_v28 = vadd.f32 1.0, %v2664_v24  ;;  %v2666_v29 = vpop.eup %2665 }
 0xe71   :  { %2667 = vrcp.f32 %v1252_v28 }
 0xe72   :  { %2669 = vpow2.f32 %v2509_v41 }
 0xe7e   :  { %v2668_v31 = vpop.eup %2667 }
 0xe7f   :  { %v1266_v32 = vmul.f32 %v2668_v31, %v2666_v29  ;;  %v1265_v33 = vmul.f32 %v2668_v31, %v1263_v30  ;;  %v2670_v43 = vpop.eup %2669 }
 0xe80   :  { %v1259_v47 = vadd.f32 1.0, %v2670_v43 }
 0xe81   :  { %1268 = vrot.lane.b32.xlu0 %v1266_v32, %s2930_s3 }
 0xe82   :  { %2671 = vrcp.f32 %v1259_v47 }
 0xe8f   :  { %v2672_v6 = vpop.eup %2671 }
 0xef3   :  { %v1269_v49 = vpop.permute.xlu0 %1268 }
 0xef4   :  { %v1271_v26 = vadd.f32 %v1269_v49, %v1265_v33 }
 0xef6   :  { %2673 = vtanh.f32 %v1271_v26 }
 0xf03   :  { %v2674_v8 = vpop.eup %2673 }
 0xf04   :  { %v1273_v9 = vmul.f32 %v2674_v8, %v2672_v6 }
 0xf06   :  { %v1282_v10 = vsel %vm1278_vm3, %v3291_v14, %v1273_v9  ;;  %v1480_v14 = vpop.f32.mrf.mxu1 }
 0xf07   :  { %1315 = vrot.lane.b32.xlu0 %v1282_v10, %s2930_s3  ;;  %v2041_v55 = vrot.slane %v1480_v14, 2  ;;  %v1931_v58 = vrot.slane %v1480_v14, 6 }
 0xf08   :  { %v3402_v17 = vpop.f32.mrf.mxu1 }
 0xf79   :  { %v1316_v11 = vpop.permute.xlu0 %1315 }
 0xf7a   :  { %2511 = vmatmul.mubr.msk.f32.gmra.mxu0 %vm393_vm0, %v1316_v11  ;;  %2513 = vmatmul.mubr.msk.f32.gmra.mxu1 %vm393_vm0, %v1316_v11 }
 0xf7b   :  { %1563 = vmatprep.mubr.f32.mxu0 %v2929_v0  ;;  %1669 = vmatprep.mubr.f32.mxu1 %v2929_v0 }
 0xf7e   :  { %1564 = vmatmul.mubr.f32.vlgmr.msra.gmra.mxu0 %v2929_v0 }
 0xf7f   :  { %1732 = vmatpush1.msra.mxu0 %v3308_v42  ;;  %1779 = vmatprep.mubr.f32.mxu0 %v2929_v0 }
 0xf80   :  { %1733 = vmatprep.subr.mxu0 %v3310_v44 }
 0xf81   :  { %1734 = vmatpush1.msra.mxu0 %v3313_v45 }
 0xf82   :  { %1735 = vmatprep.subr.mxu0 %v3317_v34 }
 0xf83   :  { %1736 = vmatpush1.msra.mxu0 %v3321_v35 }
 0xf84   :  { %1737 = vmatprep.subr.mxu0 %v3325_v46 }
 0xf85   :  { %1738 = vmatpush1.msra.mxu0 %v3329_v37 }
 0xf86   :  { %1739 = vmatprep.subr.mxu0 %v3333_v56 }
 0xf87   :  { %1740 = vmatpush1.msra.mxu0 %v3337_v38 }
 0xf88   :  { %1741 = vmatprep.subr.mxu0 %v3341_v39 }
 0xf89   :  { %1742 = vmatpush1.msra.mxu0 %v3350_v50 }
 0xf8a   :  { %1743 = vmatprep.subr.mxu0 %v3353_v51 }
 0xf8b   :  { %1744 = vmatpush1.msra.mxu0 %v3355_v52 }
 0xf8c   :  { %1745 = vmatprep.subr.mxu0 %v3357_v4 }
 0xf8d   :  { %1746 = vmatpush1.msra.mxu0 %v3361_v5 }
 0xf8e   :  { %1959 = vmatprep.subr.mxu0 %v3306_v48 }
0x103a   :  { %v1393_v19 = vpop.f32.mrf.mxu0  ;;  %v1486_v53 = vpop.f32.mrf.mxu1 }
0x103b   :  { %v1394_v54 = vadd.f32 %v1393_v19, %v1304_v15  ;;  %v1493_v57 = vrot.slane %v1486_v53, 6  ;;  %v1594_v25 = vrot.slane %v1486_v53, 2 }
0x103c   :  { %v3404_v59 = vpop.f32.mrf.mxu0  ;;  %v1488_v1 = vpop.f32.mrf.mxu1 }
0x103d   :  { %v3406_v60 = vadd.f32 %v2041_v55, %v1394_v54  ;;  %v3408_v61 = vadd.f32 %v1594_v25, %v1388_v18  ;;  %v3410_v62 = vadd.f32 %v1493_v57, %v1388_v18  ;;  %v3412_v63 = vadd.f32 %v1931_v58, %v1394_v54 }
0x103e   :  { %v1565_v22 = vpop.f32.mrf.mxu0  ;;  %v1494_v7 = vrot.slane %v1488_v1, 6  ;;  %v1595_v14 = vrot.slane %v1488_v1, 2 }
0x103f   :  { %v1570_v3 = vadd.f32 %v1565_v22, %v3410_v62 }
0x1040   :  { %v3420_v20 = vadd.f32 %v1494_v7, %v1390_v36  ;;  %v1567_v23 = vpop.f32.mrf.mxu0  ;;  %v3444_v16 = vadd.f32 %v1595_v14, %v1390_v36 }
0x1041   :  { %v2514_v40 = vmul.f32 -1.442695, %v1570_v3 }
0x1042   :  { %v1571_v24 = vadd.f32 %v1567_v23, %v3420_v20 }
0x1043   :  { %2675 = vpow2.f32 %v2514_v40 }
0x1044   :  { %2677 = vtanh.f32 %v1571_v24  ;;  %v2515_v21 = vmul.f32 -1.442695, %v1571_v24 }
0x1050   :  { %v2676_v28 = vpop.eup %2675 }
0x1051   :  { %v1575_v29 = vadd.f32 1.0, %v2676_v28  ;;  %v2678_v30 = vpop.eup %2677 }
0x1053   :  { %2679 = vrcp.f32 %v1575_v29 }
0x1054   :  { %2681 = vpow2.f32 %v2515_v21 }
0x1060   :  { %v2680_v31 = vpop.eup %2679 }
0x1061   :  { %v1586_v32 = vmul.f32 %v2680_v31, %v2678_v30  ;;  %v2682_v27 = vpop.eup %2681  ;;  %v1585_v41 = vmul.f32 0.0, %v2680_v31 }
0x1062   :  { %v1582_v33 = vadd.f32 1.0, %v2682_v27 }
0x1063   :  { %1588 = vrot.lane.b32.xlu1 %v1586_v32, %s2930_s3 }
0x1064   :  { %2683 = vrcp.f32 %v1582_v33 }
0x1071   :  { %v2684_v49 = vpop.eup %2683 }
0x10d5   :  { %v1589_v43 = vpop.permute.xlu1 %1588 }
0x10d6   :  { %v1591_v47 = vadd.f32 %v1589_v43, %v1585_v41 }
0x10d8   :  { %2685 = vtanh.f32 %v1591_v47  ;;  %v1698_v54 = vrot.slane %v1591_v47, 6 }
0x10e5   :  { %v2686_v26 = vpop.eup %2685 }
0x10e6   :  { %v1593_v6 = vmul.f32 %v2686_v26, %v2684_v49 }
0x10e8   :  { %1601 = vrot.lane.b32.xlu0 %v1593_v6, %s2930_s3 }
0x115a   :  { %v1602_v8 = vpop.permute.xlu0 %1601 }
0x115b   :  { %2516 = vmatmul.mubr.msk.f32.vlgmr.msra.gmra.mxu1 %vm393_vm0, %v1602_v8 }
0x115c   :  { %1842 = vmatpush1.msra.mxu1 %v3308_v42  ;;  %1889 = vmatprep.mubr.f32.mxu1 %v2929_v0 }
0x115d   :  { %1843 = vmatprep.subr.mxu1 %v3310_v44 }
0x115e   :  { %1844 = vmatpush1.msra.mxu1 %v3313_v45 }
0x115f   :  { %1845 = vmatprep.subr.mxu1 %v3317_v34 }
0x1160   :  { %1846 = vmatpush1.msra.mxu1 %v3321_v35 }
0x1161   :  { %1847 = vmatprep.subr.mxu1 %v3325_v46 }
0x1162   :  { %1848 = vmatpush1.msra.mxu1 %v3329_v37 }
0x1163   :  { %1849 = vmatprep.subr.mxu1 %v3333_v56 }
0x1164   :  { %1850 = vmatpush1.msra.mxu1 %v3337_v38 }
0x1165   :  { %1851 = vmatprep.subr.mxu1 %v3341_v39 }
0x1166   :  { %1852 = vmatpush1.msra.mxu1 %v3350_v50 }
0x1167   :  { %1853 = vmatprep.subr.mxu1 %v3353_v51 }
0x1168   :  { %1854 = vmatpush1.msra.mxu1 %v3355_v52 }
0x1169   :  { %1855 = vmatprep.subr.mxu1 %v3357_v4 }
0x116a   :  { %1856 = vmatpush1.msra.mxu1 %v3361_v5 }
0x116b   :  { %2068 = vmatprep.subr.mxu1 %v3306_v48 }
0x121b   :  { %v1671_v9 = vpop.f32.mrf.mxu1 }
0x121c   :  { %v1678_v10 = vrot.slane %v1671_v9, 6 }
0x121d   :  { %v1673_v13 = vpop.f32.mrf.mxu1 }
0x121e   :  { %v1682_v11 = vadd.f32 %v1678_v10, %v3408_v61  ;;  %v1679_v15 = vrot.slane %v1673_v13, 6 }
0x1220   :  { %v2517_v12 = vmul.f32 -1.442695, %v1682_v11  ;;  %v1683_v18 = vadd.f32 %v1679_v15, %v3444_v16 }
0x1222   :  { %2687 = vpow2.f32 %v2517_v12  ;;  %v2518_v22 = vmul.f32 -1.442695, %v1683_v18 }
0x1223   :  { %2689 = vtanh.f32 %v1683_v18 }
0x122f   :  { %v2688_v19 = vpop.eup %2687 }
0x1230   :  { %v1687_v53 = vadd.f32 1.0, %v2688_v19  ;;  %v2690_v55 = vpop.eup %2689 }
0x1232   :  { %2691 = vrcp.f32 %v1687_v53 }
0x1233   :  { %2693 = vpow2.f32 %v2518_v22 }
0x123f   :  { %v2692_v57 = vpop.eup %2691 }
0x1240   :  { %v1701_v25 = vmul.f32 %v2692_v57, %v2690_v55  ;;  %v1700_v58 = vmul.f32 %v2692_v57, %v1698_v54  ;;  %v2694_v3 = vpop.eup %2693 }
0x1241   :  { %v1694_v40 = vadd.f32 1.0, %v2694_v3 }
0x1242   :  { %1703 = vrot.lane.b32.xlu1 %v1701_v25, %s2930_s3 }
0x1243   :  { %2695 = vrcp.f32 %v1694_v40 }
0x1250   :  { %v2696_v36 = vpop.eup %2695 }
0x12b4   :  { %v1704_v1 = vpop.permute.xlu1 %1703 }
0x12b5   :  { %v1706_v7 = vadd.f32 %v1704_v1, %v1700_v58 }
0x12b7   :  { %2697 = vtanh.f32 %v1706_v7  ;;  %v1808_v26 = vrot.slane %v1706_v7, 6 }
0x12c4   :  { %v2698_v23 = vpop.eup %2697 }
0x12c5   :  { %v1708_v24 = vmul.f32 %v2698_v23, %v2696_v36 }
0x12c7   :  { %v1710_v28 = vrot.slane %v1708_v24, 2 }
0x12c9   :  { %1711 = vrot.lane.b32.xlu0 %v1710_v28, %s2930_s3 }
0x133b   :  { %v1712_v29 = vpop.permute.xlu0 %1711 }
0x133c   :  { %2519 = vmatmul.mubr.msk.f32.vlgmr.msra.gmra.mxu0 %vm393_vm0, %v1712_v29 }
0x133d   :  { %1960 = vmatpush1.msra.mxu0 %v3308_v42  ;;  %2007 = vmatprep.mubr.f32.mxu0 %v2929_v0 }
0x133e   :  { %1961 = vmatprep.subr.mxu0 %v3310_v44 }
0x133f   :  { %1962 = vmatpush1.msra.mxu0 %v3313_v45 }
0x1340   :  { %1963 = vmatprep.subr.mxu0 %v3317_v34 }
0x1341   :  { %1964 = vmatpush1.msra.mxu0 %v3321_v35 }
0x1342   :  { %1965 = vmatprep.subr.mxu0 %v3325_v46 }
0x1343   :  { %1966 = vmatpush1.msra.mxu0 %v3329_v37 }
0x1344   :  { %1967 = vmatprep.subr.mxu0 %v3333_v56 }
0x1345   :  { %1968 = vmatpush1.msra.mxu0 %v3337_v38 }
0x1346   :  { %1969 = vmatprep.subr.mxu0 %v3341_v39 }
0x1347   :  { %1970 = vmatpush1.msra.mxu0 %v3350_v50 }
0x1348   :  { %1971 = vmatprep.subr.mxu0 %v3353_v51 }
0x1349   :  { %1972 = vmatpush1.msra.mxu0 %v3355_v52 }
0x134a   :  { %1973 = vmatprep.subr.mxu0 %v3357_v4 }
0x134b   :  { %1974 = vmatpush1.msra.mxu0 %v3361_v5 }
0x134c   :  { %2178 = vmatprep.subr.mxu0 %v3306_v48 }
0x13fc   :  { %v1781_v30 = vpop.f32.mrf.mxu0 }
0x13fd   :  { %v1788_v31 = vrot.slane %v1781_v30, 4 }
0x13fe   :  { %v1783_v27 = vpop.f32.mrf.mxu0 }
0x13ff   :  { %v1792_v32 = vadd.f32 %v1788_v31, %v3410_v62  ;;  %v1789_v33 = vrot.slane %v1783_v27, 4 }
0x1401   :  { %v2520_v21 = vmul.f32 -1.442695, %v1792_v32  ;;  %v1793_v41 = vadd.f32 %v1789_v33, %v3420_v20 }
0x1403   :  { %2699 = vpow2.f32 %v2520_v21  ;;  %v2521_v10 = vmul.f32 -1.442695, %v1793_v41 }
0x1404   :  { %2701 = vtanh.f32 %v1793_v41 }
0x1410   :  { %v2700_v43 = vpop.eup %2699 }
0x1411   :  { %v1797_v47 = vadd.f32 1.0, %v2700_v43  ;;  %v2702_v49 = vpop.eup %2701 }
0x1413   :  { %2703 = vrcp.f32 %v1797_v47  ;;  %v1396_v47 = vadd.f32 %v3404_v59, %v3417_v2 }
0x1414   :  { %2705 = vpow2.f32 %v2521_v10 }
0x1420   :  { %v2704_v6 = vpop.eup %2703 }
0x1421   :  { %v1811_v8 = vmul.f32 %v2704_v6, %v2702_v49  ;;  %v1810_v9 = vmul.f32 %v2704_v6, %v1808_v26  ;;  %v2706_v62 = vpop.eup %2705  ;;  %v1932_v49 = vrot.slane %v3402_v17, 6 }
0x1422   :  { %v1804_v11 = vadd.f32 1.0, %v2706_v62 }
0x1423   :  { %1813 = vrot.lane.b32.xlu1 %v1811_v8, %s2930_s3  ;;  %v3515_v6 = vadd.f32 %v1932_v49, %v1396_v47 }
0x1424   :  { %2707 = vrcp.f32 %v1804_v11 }
0x1431   :  { %v2708_v20 = vpop.eup %2707 }
0x1495   :  { %v1814_v12 = vpop.permute.xlu1 %1813 }
0x1496   :  { %v1816_v13 = vadd.f32 %v1814_v12, %v1810_v9 }
0x1498   :  { %2709 = vtanh.f32 %v1816_v13  ;;  %v1918_v7 = vrot.slane %v1816_v13, 6 }
0x14a5   :  { %v2710_v14 = vpop.eup %2709 }
0x14a6   :  { %v1818_v15 = vmul.f32 %v2710_v14, %v2708_v20 }
0x14a8   :  { %v1820_v18 = vrot.slane %v1818_v15, 4 }
0x14aa   :  { %1821 = vrot.lane.b32.xlu0 %v1820_v18, %s2930_s3 }
0x151c   :  { %v1822_v19 = vpop.permute.xlu0 %1821 }
0x151d   :  { %2522 = vmatmul.mubr.msk.f32.vlgmr.msra.gmra.mxu1 %vm393_vm0, %v1822_v19 }
0x151e   :  { %2069 = vmatpush1.msra.mxu1 %v3308_v42  ;;  %2116 = vmatprep.mubr.f32.mxu1 %v2929_v0 }
0x151f   :  { %2070 = vmatprep.subr.mxu1 %v3310_v44 }
0x1520   :  { %2071 = vmatpush1.msra.mxu1 %v3313_v45 }
0x1521   :  { %2072 = vmatprep.subr.mxu1 %v3317_v34 }
0x1522   :  { %2073 = vmatpush1.msra.mxu1 %v3321_v35 }
0x1523   :  { %2074 = vmatprep.subr.mxu1 %v3325_v46 }
0x1524   :  { %2075 = vmatpush1.msra.mxu1 %v3329_v37 }
0x1525   :  { %2076 = vmatprep.subr.mxu1 %v3333_v56 }
0x1526   :  { %2077 = vmatpush1.msra.mxu1 %v3337_v38 }
0x1527   :  { %2078 = vmatprep.subr.mxu1 %v3341_v39 }
0x1528   :  { %2079 = vmatpush1.msra.mxu1 %v3350_v50 }
0x1529   :  { %2080 = vmatprep.subr.mxu1 %v3353_v51 }
0x152a   :  { %2081 = vmatpush1.msra.mxu1 %v3355_v52 }
0x152b   :  { %2082 = vmatprep.subr.mxu1 %v3357_v4 }
0x152c   :  { %2083 = vmatpush1.msra.mxu1 %v3361_v5 }
0x152d   :  { %2288 = vmatprep.subr.mxu1 %v3306_v48 }
0x15dd   :  { %v1891_v53 = vpop.f32.mrf.mxu1 }
0x15de   :  { %v1898_v55 = vrot.slane %v1891_v53, 2 }
0x15df   :  { %v1893_v25 = vpop.f32.mrf.mxu1 }
0x15e0   :  { %v1902_v54 = vadd.f32 %v1898_v55, %v3408_v61  ;;  %v1899_v58 = vrot.slane %v1893_v25, 2 }
0x15e2   :  { %v2523_v57 = vmul.f32 -1.442695, %v1902_v54  ;;  %v1903_v22 = vadd.f32 %v1899_v58, %v3444_v16 }
0x15e4   :  { %2711 = vpow2.f32 %v2523_v57  ;;  %v2524_v48 = vmul.f32 -1.442695, %v1903_v22 }
0x15e5   :  { %2713 = vtanh.f32 %v1903_v22 }
0x15f1   :  { %v2712_v3 = vpop.eup %2711 }
0x15f2   :  { %v1907_v40 = vadd.f32 1.0, %v2712_v3  ;;  %v2714_v1 = vpop.eup %2713 }
0x15f4   :  { %2715 = vrcp.f32 %v1907_v40 }
0x15f5   :  { %2717 = vpow2.f32 %v2524_v48 }
0x1601   :  { %v2716_v36 = vpop.eup %2715 }
0x1602   :  { %v1921_v23 = vmul.f32 %v2716_v36, %v2714_v1  ;;  %v1920_v24 = vmul.f32 %v2716_v36, %v1918_v7  ;;  %v2718_v61 = vpop.eup %2717 }
0x1603   :  { %v1914_v28 = vadd.f32 1.0, %v2718_v61 }
0x1604   :  { %1923 = vrot.lane.b32.xlu1 %v1921_v23, %s2930_s3 }
0x1605   :  { %2719 = vrcp.f32 %v1914_v28 }
0x1612   :  { %v2720_v16 = vpop.eup %2719 }
0x1676   :  { %v1924_v29 = vpop.permute.xlu1 %1923 }
0x1677   :  { %v1926_v30 = vadd.f32 %v1924_v29, %v1920_v24 }
0x1679   :  { %2721 = vtanh.f32 %v1926_v30  ;;  %v2030_v11 = vrot.slane %v1926_v30, 6 }
0x1686   :  { %v2722_v31 = vpop.eup %2721 }
0x1687   :  { %v1928_v32 = vmul.f32 %v2722_v31, %v2720_v16 }
0x1689   :  { %v1938_v21 = vrot.slane %v1928_v32, 6 }
0x168b   :  { %1939 = vrot.lane.b32.xlu0 %v1938_v21, %s2930_s3 }
0x16fd   :  { %v1940_v27 = vpop.permute.xlu0 %1939 }
0x16fe   :  { %2525 = vmatmul.mubr.msk.f32.vlgmr.msra.gmra.mxu0 %vm393_vm0, %v1940_v27 }
0x16ff   :  { %2179 = vmatpush1.msra.mxu0 %v3308_v42  ;;  %2226 = vmatprep.mubr.f32.mxu0 %v2929_v0 }
0x1700   :  { %2180 = vmatprep.subr.mxu0 %v3310_v44 }
0x1701   :  { %2181 = vmatpush1.msra.mxu0 %v3313_v45 }
0x1702   :  { %2182 = vmatprep.subr.mxu0 %v3317_v34 }
0x1703   :  { %2183 = vmatpush1.msra.mxu0 %v3321_v35 }
0x1704   :  { %2184 = vmatprep.subr.mxu0 %v3325_v46 }
0x1705   :  { %2185 = vmatpush1.msra.mxu0 %v3329_v37 }
0x1706   :  { %2186 = vmatprep.subr.mxu0 %v3333_v56 }
0x1707   :  { %2187 = vmatpush1.msra.mxu0 %v3337_v38 }
0x1708   :  { %2188 = vmatprep.subr.mxu0 %v3341_v39 }
0x1709   :  { %2189 = vmatpush1.msra.mxu0 %v3350_v50 }
0x170a   :  { %2190 = vmatprep.subr.mxu0 %v3353_v51 }
0x170b   :  { %2191 = vmatpush1.msra.mxu0 %v3355_v52 }
0x170c   :  { %2192 = vmatprep.subr.mxu0 %v3357_v4 }
0x170d   :  { %2193 = vmatpush1.msra.mxu0 %v3361_v5 }
0x170e   :  { %2548 = vmatprep.subr.mxu0 %v2929_v0 }
0x17be   :  { %v2009_v33 = vpop.f32.mrf.mxu0 }
0x17bf   :  { %v2014_v41 = vadd.f32 %v2009_v33, %v3412_v63 }
0x17c0   :  { %v2011_v26 = vpop.f32.mrf.mxu0 }
0x17c1   :  { %v2526_v43 = vmul.f32 -1.442695, %v2014_v41  ;;  %v2015_v8 = vadd.f32 %v2011_v26, %v3515_v6 }
0x17c3   :  { %2723 = vpow2.f32 %v2526_v43  ;;  %v2527_v14 = vmul.f32 -1.442695, %v2015_v8 }
0x17c4   :  { %2725 = vtanh.f32 %v2015_v8 }
0x17d0   :  { %v2724_v9 = vpop.eup %2723 }
0x17d1   :  { %v2019_v10 = vadd.f32 1.0, %v2724_v9  ;;  %v2726_v62 = vpop.eup %2725 }
0x17d3   :  { %2727 = vrcp.f32 %v2019_v10 }
0x17d4   :  { %2729 = vpow2.f32 %v2527_v14 }
0x17e0   :  { %v2728_v12 = vpop.eup %2727 }
0x17e1   :  { %v2033_v13 = vmul.f32 %v2728_v12, %v2726_v62  ;;  %v2032_v20 = vmul.f32 %v2728_v12, %v2030_v11  ;;  %v2730_v59 = vpop.eup %2729 }
0x17e2   :  { %v2026_v2 = vadd.f32 1.0, %v2730_v59 }
0x17e3   :  { %2035 = vrot.lane.b32.xlu1 %v2033_v13, %s2930_s3 }
0x17e4   :  { %2731 = vrcp.f32 %v2026_v2 }
0x17f1   :  { %v2732_v19 = vpop.eup %2731 }
0x1855   :  { %v2036_v15 = vpop.permute.xlu1 %2035 }
0x1856   :  { %v2038_v18 = vadd.f32 %v2036_v15, %v2032_v20 }
0x1858   :  { %2733 = vtanh.f32 %v2038_v18 }
0x1865   :  { %v2734_v53 = vpop.eup %2733 }
0x1866   :  { %v2040_v55 = vmul.f32 %v2734_v53, %v2732_v19 }
0x1868   :  { %2048 = vrot.lane.b32.xlu0 %v2040_v55, %s2930_s3 }
0x18da   :  { %v2049_v54 = vpop.permute.xlu0 %2048 }
0x18db   :  { %2528 = vmatmul.mubr.msk.f32.vlgmr.msra.gmra.mxu1 %vm393_vm0, %v2049_v54 }
0x18dc   :  { %2289 = vmatpush1.msra.mxu1 %v3308_v42  ;;  %2336 = vmatprep.mubr.f32.mxu1 %v2929_v0 }
0x18dd   :  { %2290 = vmatprep.subr.mxu1 %v3310_v44 }
0x18de   :  { %2291 = vmatpush1.msra.mxu1 %v3313_v45 }
0x18df   :  { %2292 = vmatprep.subr.mxu1 %v3317_v34 }
0x18e0   :  { %2293 = vmatpush1.msra.mxu1 %v3321_v35 }
0x18e1   :  { %2294 = vmatprep.subr.mxu1 %v3325_v46  ;;  %v2042_v46 = vrot.slane %v3402_v17, 2 }
0x18e2   :  { %2295 = vmatpush1.msra.mxu1 %v3329_v37 }
0x18e3   :  { %2296 = vmatprep.subr.mxu1 %v3333_v56  ;;  %v3539_v56 = vadd.f32 %v2042_v46, %v1396_v47  ;;  %v2379_v46 = vld [vmem:[%s3602_s9 + $0x18] sm:$0xff] }
0x18e4   :  { %2297 = vmatpush1.msra.mxu1 %v3337_v38 }
0x18e5   :  { %2298 = vmatprep.subr.mxu1 %v3341_v39 }
0x18e6   :  { %2299 = vmatpush1.msra.mxu1 %v3350_v50 }
0x18e7   :  { %2300 = vmatprep.subr.mxu1 %v3353_v51 }
0x18e8   :  { %2301 = vmatpush1.msra.mxu1 %v3355_v52  ;;  %v2145_v52 = vrot.slane %v2038_v18, 6 }
0x18e9   :  { %2302 = vmatprep.subr.mxu1 %v3357_v4 }
0x18ea   :  { %2303 = vmatpush1.msra.mxu1 %v3361_v5 }
0x199b   :  { %v2118_v42 = vpop.f32.mrf.mxu1 }
0x199c   :  { %v2125_v44 = vrot.slane %v2118_v42, 6 }
0x199d   :  { %v2120_v35 = vpop.f32.mrf.mxu1 }
0x199e   :  { %v2129_v45 = vadd.f32 %v2125_v44, %v3406_v60  ;;  %v2126_v37 = vrot.slane %v2120_v35, 6  ;;  %v2380_v35 = vld [vmem:[%s3602_s9 + $0x20] sm:$0xff] }
0x19a0   :  { %v2529_v34 = vmul.f32 -1.442695, %v2129_v45  ;;  %v2130_v38 = vadd.f32 %v2126_v37, %v3539_v56  ;;  %v2382_v45 = vld [vmem:[%s3602_s9 + $0x30] sm:$0xff] }
0x19a1   :  { %v2378_v37 = vld [vmem:[%s3602_s9 + $0x10] sm:$0xff] }
0x19a2   :  { %2735 = vpow2.f32 %v2529_v34  ;;  %v2530_v25 = vmul.f32 -1.442695, %v2130_v38  ;;  %v2381_v34 = vld [vmem:[%s3602_s9 + $0x28] sm:$0xff] }
0x19a3   :  { %2737 = vtanh.f32 %v2130_v38  ;;  %v2376_v38 = vld [vmem:[%s3602_s9] sm:$0xff] }
0x19af   :  { %v2736_v39 = vpop.eup %2735 }
0x19b0   :  { %v2134_v50 = vadd.f32 1.0, %v2736_v39  ;;  %v2738_v51 = vpop.eup %2737 }
0x19b2   :  { %2739 = vrcp.f32 %v2134_v50 }
0x19b3   :  { %2741 = vpow2.f32 %v2530_v25 }
0x19bf   :  { %v2740_v4 = vpop.eup %2739 }
0x19c0   :  { %v2148_v5 = vmul.f32 %v2740_v4, %v2738_v51  ;;  %v2147_v57 = vmul.f32 %v2740_v4, %v2145_v52  ;;  %v2742_v58 = vpop.eup %2741 }
0x19c1   :  { %v2141_v17 = vadd.f32 1.0, %v2742_v58 }
0x19c2   :  { %2150 = vrot.lane.b32.xlu1 %v2148_v5, %s2930_s3 }
0x19c3   :  { %2743 = vrcp.f32 %v2141_v17 }
0x19d0   :  { %v2744_v40 = vpop.eup %2743 }
0x1a34   :  { %v2151_v22 = vpop.permute.xlu1 %2150 }
0x1a35   :  { %v2153_v3 = vadd.f32 %v2151_v22, %v2147_v57 }
0x1a37   :  { %2745 = vtanh.f32 %v2153_v3  ;;  %v2255_v27 = vrot.slane %v2153_v3, 6 }
0x1a44   :  { %v2746_v1 = vpop.eup %2745 }
0x1a45   :  { %v2155_v7 = vmul.f32 %v2746_v1, %v2744_v40 }
0x1a47   :  { %v2157_v36 = vrot.slane %v2155_v7, 2 }
0x1a49   :  { %2158 = vrot.lane.b32.xlu0 %v2157_v36, %s2930_s3 }
0x1abb   :  { %v2159_v23 = vpop.permute.xlu0 %2158 }
0x1abc   :  { %2531 = vmatmul.mubr.msk.f32.vlgmr.msra.gmra.mxu0 %vm393_vm0, %v2159_v23 }
0x1abd   :  { %2564 = vmatprep.mubr.msk.f32.mxu0 %vm2931_vm4, %v2929_v0 }
0x1b7c   :  { %v2228_v24 = vpop.f32.mrf.mxu0 }
0x1b7d   :  { %v2235_v48 = vrot.slane %v2228_v24, 4 }
0x1b7e   :  { %v2230_v29 = vpop.f32.mrf.mxu0 }
0x1b7f   :  { %v2239_v61 = vadd.f32 %v2235_v48, %v3412_v63  ;;  %v2236_v30 = vrot.slane %v2230_v29, 4 }
0x1b81   :  { %v2532_v28 = vmul.f32 -1.442695, %v2239_v61  ;;  %v2240_v16 = vadd.f32 %v2236_v30, %v3515_v6 }
0x1b83   :  { %2747 = vpow2.f32 %v2532_v28  ;;  %v2533_v47 = vmul.f32 -1.442695, %v2240_v16 }
0x1b84   :  { %2749 = vtanh.f32 %v2240_v16 }
0x1b90   :  { %v2748_v31 = vpop.eup %2747 }
0x1b91   :  { %v2244_v32 = vadd.f32 1.0, %v2748_v31  ;;  %v2750_v21 = vpop.eup %2749 }
0x1b93   :  { %2751 = vrcp.f32 %v2244_v32 }
0x1b94   :  { %2753 = vpow2.f32 %v2533_v47 }
0x1ba0   :  { %v2752_v33 = vpop.eup %2751 }
0x1ba1   :  { %v2258_v41 = vmul.f32 %v2752_v33, %v2750_v21  ;;  %v2257_v43 = vmul.f32 %v2752_v33, %v2255_v27  ;;  %v2754_v63 = vpop.eup %2753 }
0x1ba2   :  { %v2251_v49 = vadd.f32 1.0, %v2754_v63 }
0x1ba3   :  { %2260 = vrot.lane.b32.xlu1 %v2258_v41, %s2930_s3 }
0x1ba4   :  { %2755 = vrcp.f32 %v2251_v49 }
0x1bb1   :  { %v2756_v6 = vpop.eup %2755 }
0x1c15   :  { %v2261_v26 = vpop.permute.xlu1 %2260 }
0x1c16   :  { %v2263_v8 = vadd.f32 %v2261_v26, %v2257_v43 }
0x1c18   :  { %2757 = vtanh.f32 %v2263_v8  ;;  %v2365_v55 = vrot.slane %v2263_v8, 6 }
0x1c25   :  { %v2758_v9 = vpop.eup %2757 }
0x1c26   :  { %v2265_v10 = vmul.f32 %v2758_v9, %v2756_v6 }
0x1c28   :  { %v2267_v62 = vrot.slane %v2265_v10, 4 }
0x1c2a   :  { %2268 = vrot.lane.b32.xlu0 %v2267_v62, %s2930_s3 }
0x1c9c   :  { %v2269_v11 = vpop.permute.xlu0 %2268 }
0x1c9d   :  { %2534 = vmatmul.mubr.msk.f32.vlgmr.msra.gmra.mxu1 %vm393_vm0, %v2269_v11 }
0x1d5d   :  { %v2338_v12 = vpop.f32.mrf.mxu1 }
0x1d5e   :  { %v2345_v13 = vrot.slane %v2338_v12, 2 }
0x1d5f   :  { %v2340_v59 = vpop.f32.mrf.mxu1 }
0x1d60   :  { %v2349_v20 = vadd.f32 %v2345_v13, %v3406_v60  ;;  %v2346_v2 = vrot.slane %v2340_v59, 2  ;;  %v2383_v60 = vld [vmem:[%s3602_s9 + $0x38] sm:$0xff] }
0x1d61   :  { %2549 = vmatpush3.msra.mxu0 %v2383_v60 }
0x1d62   :  { %v2535_v14 = vmul.f32 -1.442695, %v2349_v20  ;;  %v2350_v15 = vadd.f32 %v2346_v2, %v3539_v56  ;;  %2550 = vmatprep.subr.mxu0 %v2929_v0  ;;  %v2377_v56 = vld [vmem:[%s3602_s9 + $0x8] sm:$0xff] }
0x1d63   :  { %2551 = vmatpush3.msra.mxu0 %v2382_v45 }
0x1d64   :  { %2759 = vpow2.f32 %v2535_v14  ;;  %2552 = vmatprep.subr.mxu0 %v2929_v0  ;;  %v2536_v39 = vmul.f32 -1.442695, %v2350_v15 }
0x1d65   :  { %2761 = vtanh.f32 %v2350_v15  ;;  %2553 = vmatpush3.msra.mxu0 %v2381_v34 }
0x1d66   :  { %2554 = vmatprep.subr.mxu0 %v2929_v0 }
0x1d67   :  { %2555 = vmatpush3.msra.mxu0 %v2380_v35 }
0x1d68   :  { %2556 = vmatprep.subr.mxu0 %v2929_v0 }
0x1d69   :  { %2557 = vmatpush3.msra.mxu0 %v2379_v46 }
0x1d6a   :  { %2558 = vmatprep.subr.mxu0 %v2929_v0 }
0x1d6b   :  { %2559 = vmatpush3.msra.mxu0 %v2378_v37 }
0x1d6c   :  { %2560 = vmatprep.subr.mxu0 %v2929_v0 }
0x1d6d   :  { %2561 = vmatpush3.msra.mxu0 %v2377_v56 }
0x1d6e   :  { %2562 = vmatprep.subr.mxu0 %v2929_v0  ;;  %v2537_v0 = vld [vmem:[%s3603_s10] ss:$0 sm:$0xff] }
0x1d6f   :  { %2563 = vmatpush3.msra.mxu0 %v2376_v38 }
0x1d71   :  { %v2760_v18 = vpop.eup %2759 }
0x1d72   :  { %v2354_v19 = vadd.f32 1.0, %v2760_v18  ;;  %v2762_v53 = vpop.eup %2761 }
0x1d74   :  { %2763 = vrcp.f32 %v2354_v19 }
0x1d75   :  { %2765 = vpow2.f32 %v2536_v39 }
0x1d81   :  { %v2764_v54 = vpop.eup %2763 }
0x1d82   :  { %v2368_v42 = vmul.f32 %v2764_v54, %v2762_v53  ;;  %v2367_v44 = vmul.f32 %v2764_v54, %v2365_v55  ;;  %v2766_v50 = vpop.eup %2765 }
0x1d83   :  { %v2361_v51 = vadd.f32 1.0, %v2766_v50 }
0x1d84   :  { %2370 = vrot.lane.b32.xlu1 %v2368_v42, %s2930_s3 }
0x1d85   :  { %2767 = vrcp.f32 %v2361_v51 }
0x1d92   :  { %v2768_v5 = vpop.eup %2767 }
0x1df6   :  { %v2371_v52 = vpop.permute.xlu1 %2370 }
0x1df7   :  { %v2373_v4 = vadd.f32 %v2371_v52, %v2367_v44 }
0x1df9   :  { %2769 = vtanh.f32 %v2373_v4 }
0x1e06   :  { %v2770_v57 = vpop.eup %2769 }
0x1e07   :  { %v2375_v25 = vmul.f32 %v2770_v57, %v2768_v5 }
0x1e09   :  { %v2392_v58 = vrot.slane %v2375_v25, 6 }
0x1e0b   :  { %2393 = vrot.lane.b32.xlu0 %v2392_v58, %s2930_s3 }
0x1e7d   :  { %v2394_v17 = vpop.permute.xlu0 %2393 }
0x1e7e   :  { %2565 = vmatmul.mubr.msk.f32.vlgmr.msra.gmra.mxu0 %vm393_vm0, %v2394_v17 }
0x1f3e   :  { %v2463_v22 = vpop.f32.mrf.mxu0 }
0x1f3f   :  { %v2464_v3 = vadd.f32 %v2537_v0, %v2463_v22 }
0x1f40   :  { %v2566_v40 = vpop.f32.mrf.mxu0 }
0x1f41   :  { %2468 = vst.msk [vmem:[#allocation13] sm:$0x3] %vm2467_vm5, %v2464_v3 }
0x1f42   :  { %2902 = shalt.err (!%p2899_p6)
}
0x1f43   :  { %2478 = dma.vmem_to_hbm [thread:$0]  %s2476_s27, 32, %s3604_s11, [#allocation4]  }
0x1f44   :  { %2919 = dma.done.wait [#allocation4], 32  }
0x1f45   :  { %2920 = vsyncadd [#allocation4], 4294967264 }
0x1f46   :  { %2482 = vsyncpa [#allocation3], 1 }
0x1f47   :  { %2483 = vsyncpa [#allocation6], 1 }
0x1f48   :  { %2484 = vsyncpa [#allocation9], 1 }
0x1f49   :  { %2485 = vsyncpa [#allocation12], 1 }
0x1f4a   :  { %2486 = vsyncpa [#allocation4], 1 }

</bundles_post_ra>
